<compile_context>
chip_gen: v6e
topology: v6e:2x2x1
jax: 0.10.0
libtpu: 0.0.40
codegen_flags: <defaults>
</compile_context>

<pallas_src>
import functools

import jax
import jax.numpy as jnp
import numpy as np
from jax.experimental import pallas as pl
from jax.experimental.pallas import tpu as pltpu

_VMEM_LIMIT = 40 * 1024 * 1024   # <= 64 MiB physical on v7x, ample on v5e/v6e


# ----------------------------------------------------------------------------
# Shared store helper: optionally emit the block already zero-padded by 1.
# ----------------------------------------------------------------------------
def _store_maybe_padded(o_ref, y, pad_out):
    """Store y (H, W, C) into o_ref block (1, H(+2), W(+2), C)."""
    if pad_out:
        h, w, _ = y.shape
        o_ref[0] = jnp.zeros(o_ref.shape[1:], o_ref.dtype)      # zero border
        o_ref[0, 1:1 + h, 1:1 + w, :] = y.astype(o_ref.dtype)   # interior
    else:
        o_ref[0] = y.astype(o_ref.dtype)


# ----------------------------------------------------------------------------
# Pallas kernels
# ----------------------------------------------------------------------------
def _conv4x4s2_kernel(xs_ref, w_ref, b_ref, o_ref, *, ho, wo, pad_out):
    """4x4 / stride-2 / pad-1 conv + bias + ReLU on one phase-stacked image.

    xs_ref: (1, ho+1, wo+1, 4*cin)  phases of the zero-padded input.
    w_ref : (2, 8*cin, cout)        2 row-taps; (col-tap, phase, cin) folded into K.
    """
    kdim = w_ref.shape[1]
    cout = w_ref.shape[2]
    xs = xs_ref[0]
    acc = jnp.zeros((ho * wo, cout), jnp.float32)
    for a in range(2):                                     # 2 row taps of the 2x2 conv
        row = xs[a:a + ho]                                 # (ho, wo+1, 4*cin)
        cat = jnp.concatenate([row[:, 0:wo], row[:, 1:1 + wo]], axis=-1)
        acc = acc + jnp.dot(cat.reshape(ho * wo, kdim), w_ref[a],
                            preferred_element_type=jnp.float32)
    acc = jnp.maximum(acc + b_ref[...], 0.0)               # bias + trailing ReLU (f32)
    _store_maybe_padded(o_ref, acc.reshape(ho, wo, cout), pad_out)


def _conv3x3_kernel(xp_ref, w_ref, b_ref, o_ref, *, h, w, relu_out, pad_out):
    """3x3 / stride-1 / pad-1 conv (+bias, optional ReLU) on one padded image.

    xp_ref: (1, h+2, w+2, cin);  w_ref: (3, 3*cin, cout)  (W-taps folded into K).
    """
    kdim = w_ref.shape[1]
    cout = w_ref.shape[2]
    xb = xp_ref[0]
    acc = jnp.zeros((h * w, cout), jnp.float32)
    for ki in range(3):
        row = xb[ki:ki + h]                                # (h, w+2, cin)
        cat = jnp.concatenate(
            [row[:, 0:w], row[:, 1:1 + w], row[:, 2:2 + w]], axis=-1)
        acc = acc + jnp.dot(cat.reshape(h * w, kdim), w_ref[ki],
                            preferred_element_type=jnp.float32)
    acc = acc + b_ref[...]
    if relu_out:
        acc = jnp.maximum(acc, 0.0)
    _store_maybe_padded(o_ref, acc.reshape(h, w, cout), pad_out)


def _residual_kernel(xp_ref, w3_ref, w1_ref, o_ref, *, h, w, final_relu, pad_out):
    """Fused residual layer on one zero-padded image:
         y = x + conv1x1(relu(conv3x3(relu(x))))   (+ optional trailing ReLU).
    The skip operand is sliced from the same padded block (no second read)."""
    kdim = w3_ref.shape[1]                                 # 3*c
    c = xp_ref.shape[-1]
    xb = xp_ref[0]                                         # (h+2, w+2, c), zero border
    xr = jnp.maximum(xb, 0)                                # relu(x); border stays zero
    acc = jnp.zeros((h * w, w3_ref.shape[2]), jnp.float32)
    for ki in range(3):
        row = xr[ki:ki + h]
        cat = jnp.concatenate(
            [row[:, 0:w], row[:, 1:1 + w], row[:, 2:2 + w]], axis=-1)
        acc = acc + jnp.dot(cat.reshape(h * w, kdim), w3_ref[ki],
                            preferred_element_type=jnp.float32)
    t = jnp.maximum(acc, 0.0).astype(jnp.bfloat16)         # intermediate stays in VMEM
    branch = jnp.dot(t, w1_ref[...],
                     preferred_element_type=jnp.float32).reshape(h, w, c)
    y = xb[1:1 + h, 1:1 + w, :].astype(jnp.float32) + branch   # skip add in f32
    if final_relu:
        y = jnp.maximum(y, 0.0)
    _store_maybe_padded(o_ref, y, pad_out)


# ----------------------------------------------------------------------------
# Wrappers (JAX glue: phase extraction / weight packing / pallas_call plumbing)
# ----------------------------------------------------------------------------
def conv4x4s2_relu(xp, w, b, *, pad_out, out_dtype):
    """4x4, stride-2, pad-1 conv + ReLU.  `xp` is the ZERO-PADDED input
    (N, H+2, W+2, Cin); output is (N, H/2(+2), W/2(+2), Cout)."""
    n, hp, wp, cin = xp.shape
    h, wd = hp - 2, wp - 2
    assert h % 2 == 0 and wd % 2 == 0, "stride-2 conv expects even H, W"
    ho, wo = h // 2, wd // 2
    cout = w.shape[-1]
    # Space-to-depth: 4 phases of the padded input, each (N, ho+1, wo+1, Cin),
    # stacked along channels (p-major, q-minor).  ~1x activation bytes in HBM.
    xs = jnp.concatenate(
        [xp[:, p::2, q::2, :] for p in (0, 1) for q in (0, 1)],
        axis=-1).astype(jnp.bfloat16)                      # (N, ho+1, wo+1, 4*cin)
    # Weights: for each 2x2 row tap `a`, fold (col tap b, phase p, q, cin) into K.
    wa = []
    for a in (0, 1):
        blocks = [w[2 * a + p, 2 * b + q]                  # (cin, cout)
                  for b in (0, 1) for p in (0, 1) for q in (0, 1)]
        wa.append(jnp.concatenate(blocks, axis=0))         # (8*cin, cout)
    w2 = jnp.stack(wa, axis=0).astype(jnp.bfloat16)        # (2, 8*cin, cout)
    bm = b.reshape(1, cout).astype(jnp.float32)

    oh = ho + 2 if pad_out else ho
    ow = wo + 2 if pad_out else wo
    kern = functools.partial(_conv4x4s2_kernel, ho=ho, wo=wo, pad_out=pad_out)
    return pl.pallas_call(
        kern,
        out_shape=jax.ShapeDtypeStruct((n, oh, ow, cout), out_dtype),
        grid=(n,),
        in_specs=[
            pl.BlockSpec((1, ho + 1, wo + 1, 4 * cin), lambda i: (i, 0, 0, 0)),
            pl.BlockSpec((2, 8 * cin, cout), lambda i: (0, 0, 0)),
            pl.BlockSpec((1, cout), lambda i: (0, 0)),
        ],
        out_specs=pl.BlockSpec((1, oh, ow, cout), lambda i: (i, 0, 0, 0)),
        compiler_params=pltpu.CompilerParams(
            dimension_semantics=("parallel",), vmem_limit_bytes=_VMEM_LIMIT),
        cost_estimate=pl.CostEstimate(
            flops=2 * n * ho * wo * 16 * cin * cout, transcendentals=0,
            bytes_accessed=(xs.size * 2 + w2.size * 2 + bm.size * 4
                            + n * oh * ow * cout * jnp.dtype(out_dtype).itemsize)),
    )(xs, w2, bm)


def conv3x3(xp, w, b, *, relu_out, pad_out, out_dtype):
    """3x3, stride-1, pad-1 conv on a ZERO-PADDED input (N, H+2, W+2, Cin)."""
    n, hp, wp, cin = xp.shape
    h, wd = hp - 2, wp - 2
    cout = w.shape[-1]
    w3 = w.reshape(3, 3 * cin, cout).astype(jnp.bfloat16)  # kj folded into K
    bm = b.reshape(1, cout).astype(jnp.float32)
    oh = h + 2 if pad_out else h
    ow = wd + 2 if pad_out else wd
    kern = functools.partial(_conv3x3_kernel, h=h, w=wd,
                             relu_out=relu_out, pad_out=pad_out)
    return pl.pallas_call(
        kern,
        out_shape=jax.ShapeDtypeStruct((n, oh, ow, cout), out_dtype),
        grid=(n,),
        in_specs=[
            pl.BlockSpec((1, hp, wp, cin), lambda i: (i, 0, 0, 0)),
            pl.BlockSpec((3, 3 * cin, cout), lambda i: (0, 0, 0)),
            pl.BlockSpec((1, cout), lambda i: (0, 0)),
        ],
        out_specs=pl.BlockSpec((1, oh, ow, cout), lambda i: (i, 0, 0, 0)),
        compiler_params=pltpu.CompilerParams(
            dimension_semantics=("parallel",), vmem_limit_bytes=_VMEM_LIMIT),
        cost_estimate=pl.CostEstimate(
            flops=2 * n * h * wd * 9 * cin * cout, transcendentals=0,
            bytes_accessed=(xp.size * 2 + w3.size * 2 + bm.size * 4
                            + n * oh * ow * cout * jnp.dtype(out_dtype).itemsize)),
    )(xp.astype(jnp.bfloat16), w3, bm)


def residual_layer(xp, w3, w1, *, final_relu, pad_out, out_dtype):
    """One fused residual layer on a ZERO-PADDED input (N, H+2, W+2, C)."""
    n, hp, wp, c = xp.shape
    h, wd = hp - 2, wp - 2
    cr = w3.shape[-1]
    w3m = w3.reshape(3, 3 * c, cr).astype(jnp.bfloat16)
    w1m = w1.reshape(cr, c).astype(jnp.bfloat16)
    oh = h + 2 if pad_out else h
    ow = wd + 2 if pad_out else wd
    kern = functools.partial(_residual_kernel, h=h, w=wd,
                             final_relu=final_relu, pad_out=pad_out)
    return pl.pallas_call(
        kern,
        out_shape=jax.ShapeDtypeStruct((n, oh, ow, c), out_dtype),
        grid=(n,),
        in_specs=[
            pl.BlockSpec((1, hp, wp, c), lambda i: (i, 0, 0, 0)),
            pl.BlockSpec((3, 3 * c, cr), lambda i: (0, 0, 0)),
            pl.BlockSpec((cr, c), lambda i: (0, 0)),
        ],
        out_specs=pl.BlockSpec((1, oh, ow, c), lambda i: (i, 0, 0, 0)),
        compiler_params=pltpu.CompilerParams(
            dimension_semantics=("parallel",), vmem_limit_bytes=_VMEM_LIMIT),
        cost_estimate=pl.CostEstimate(
            flops=2 * n * h * wd * (9 * c * cr + cr * c), transcendentals=0,
            bytes_accessed=(xp.size * 2 + w3m.size * 2 + w1m.size * 2
                            + n * oh * ow * c * jnp.dtype(out_dtype).itemsize)),
    )(xp.astype(jnp.bfloat16), w3m, w1m)


# ----------------------------------------------------------------------------
# Full Encoder forward (NCHW in / NCHW out, like the PyTorch module)
# ----------------------------------------------------------------------------
def _encoder_forward(x_nchw, params):
    x = jnp.transpose(x_nchw, (0, 2, 3, 1)).astype(jnp.float32)   # NCHW -> NHWC
    xp = jnp.pad(x, ((0, 0), (1, 1), (1, 1), (0, 0)))             # only XLA pad in the net
    a1 = conv4x4s2_relu(xp, params["w1"], params["b1"],
                        pad_out=True, out_dtype=jnp.bfloat16)      # pad(relu(conv_1))
    a2 = conv4x4s2_relu(a1, params["w2"], params["b2"],
                        pad_out=True, out_dtype=jnp.bfloat16)      # pad(relu(conv_2))
    n_layers = len(params["res"])
    if n_layers == 0:
        # ResidualStack with 0 layers is just a trailing ReLU on conv_3's output.
        y = conv3x3(a2, params["w3"], params["b3"],
                    relu_out=True, pad_out=False, out_dtype=jnp.float32)
        return jnp.transpose(y, (0, 3, 1, 2))
    x_cur = conv3x3(a2, params["w3"], params["b3"],
                    relu_out=False, pad_out=True, out_dtype=jnp.bfloat16)
    for l, (wr3, wr1) in enumerate(params["res"]):
        last = (l == n_layers - 1)
        x_cur = residual_layer(x_cur, wr3, wr1, final_relu=last,
                               pad_out=not last,
                               out_dtype=jnp.float32 if last else jnp.bfloat16)
    return jnp.transpose(x_cur, (0, 3, 1, 2))                      # NHWC -> NCHW


encoder_forward = jax.jit(_encoder_forward)


# ----------------------------------------------------------------------------
# Deterministic parameter init (PyTorch Conv2d-like uniform(+-1/sqrt(fan_in)))
# ----------------------------------------------------------------------------
def init_params(key, in_channels, num_hiddens, num_residual_layers,
                num_residual_hiddens):
    def conv_init(key, kh, kw, cin, cout, bias):
        w_key, b_key = jax.random.split(key)
        bound = 1.0 / np.sqrt(kh * kw * cin)
        w = jax.random.uniform(w_key, (kh, kw, cin, cout), jnp.float32,
                               -bound, bound)
        b = (jax.random.uniform(b_key, (cout,), jnp.float32, -bound, bound)
             if bias else None)
        return w, b

    keys = jax.random.split(key, 3 + 2 * num_residual_layers)
    nh2 = num_hiddens // 2
    w1, b1 = conv_init(keys[0], 4, 4, in_channels, nh2, True)
    w2, b2 = conv_init(keys[1], 4, 4, nh2, num_hiddens, True)
    w3, b3 = conv_init(keys[2], 3, 3, num_hiddens, num_hiddens, True)
    res = []
    for l in range(num_residual_layers):
        wr3, _ = conv_init(keys[3 + 2 * l], 3, 3, num_hiddens,
                           num_residual_hiddens, False)
        wr1, _ = conv_init(keys[4 + 2 * l], 1, 1, num_residual_hiddens,
                           num_hiddens, False)
        res.append((wr3, wr1))
    return {"w1": w1, "b1": b1, "w2": w2, "b2": b2, "w3": w3, "b3": b3,
            "res": res}


# ----------------------------------------------------------------------------
# Pure-JAX f32 reference (correctness sanity check)
# ----------------------------------------------------------------------------
def _ref_conv(x, w, b, stride, padding):
    y = jax.lax.conv_general_dilated(
        x, w, window_strides=(stride, stride),
        padding=[(padding, padding), (padding, padding)],
        dimension_numbers=("NHWC", "HWIO", "NHWC"))
    if b is not None:
        y = y + b
    return y


def encoder_reference(x_nchw, params):
    x = jnp.transpose(x_nchw, (0, 2, 3, 1)).astype(jnp.float32)
    x = jax.nn.relu(_ref_conv(x, params["w1"], params["b1"], 2, 1))
    x = jax.nn.relu(_ref_conv(x, params["w2"], params["b2"], 2, 1))
    x = _ref_conv(x, params["w3"], params["b3"], 1, 1)
    for wr3, wr1 in params["res"]:
        t = _ref_conv(jax.nn.relu(x), wr3, None, 1, 1)
        t = _ref_conv(jax.nn.relu(t), wr1, None, 1, 0)
        x = x + t
    x = jax.nn.relu(x)
    return jnp.transpose(x, (0, 3, 1, 2))


# ----------------------------------------------------------------------------
if __name__ == "__main__":
    batch = 2
    in_channels = 3
    spatial = 16
    num_hiddens = 32
    num_residual_layers = 2
    num_residual_hiddens = 8

    key = jax.random.PRNGKey(0)
    pkey, xkey = jax.random.split(key)
    params = init_params(pkey, in_channels, num_hiddens,
                         num_residual_layers, num_residual_hiddens)
    x = jax.random.normal(xkey, (batch, in_channels, spatial, spatial),
                          jnp.float32)

    out = jax.block_until_ready(encoder_forward(x, params))
    assert out.shape == (batch, num_hiddens, spatial // 4, spatial // 4), out.shape

    ref = jax.block_until_ready(encoder_reference(x, params))
    # bf16 MXU operands + bf16 inter-layer activation storage (f32 accumulate)
    # => loosened tolerance vs. the pure-f32 reference; real bugs (wrong tap /
    # missing bias) would show errors ~1e-1, far above these bounds.
    np.testing.assert_allclose(np.asarray(out, dtype=np.float32),
                               np.asarray(ref), rtol=5e-2, atol=2e-2)

    print("KERNEL_OK")
</pallas_src>

<mosaic_0001>
module attributes {stable_mosaic.version = 11 : i64} {
  func.func @_conv4x4s2_kernel(%arg0: i32, %arg1: memref<1x9x9x12xbf16, #tpu.memory_space<vmem>>, %arg2: memref<2x24x16xbf16, #tpu.memory_space<vmem>>, %arg3: memref<1x16xf32, #tpu.memory_space<vmem>>, %arg4: memref<1x10x10x16xbf16, #tpu.memory_space<vmem>>) attributes {dimension_semantics = [#tpu.dimension_semantics<parallel>], iteration_bounds = array<i64: 2>, scalar_prefetch = 0 : i64, scratch_operands = 0 : i64, tpu.core_type = #tpu.core_type<tc>, window_params = [{transform_indices = @transform_0, window_bounds = array<i64: 1, 9, 9, 12>}, {pipeline_mode = #tpu.pipeline_mode<synchronous>, transform_indices = @transform_1, window_bounds = array<i64: 2, 24, 16>}, {pipeline_mode = #tpu.pipeline_mode<synchronous>, transform_indices = @transform_2, window_bounds = array<i64: 1, 16>}, {transform_indices = @transform_3, window_bounds = array<i64: 1, 10, 10, 16>}]} {
    %c0 = arith.constant 0 : index
    %c0_0 = arith.constant 0 : index
    %c0_1 = arith.constant 0 : index
    %c0_2 = arith.constant 0 : index
    %0 = vector.load %arg1[%c0, %c0_0, %c0_1, %c0_2] : memref<1x9x9x12xbf16, #tpu.memory_space<vmem>>, vector<1x9x9x12xbf16>
    %1 = vector.shape_cast %0 : vector<1x9x9x12xbf16> to vector<9x9x12xbf16>
    %cst = arith.constant 0.000000e+00 : f32
    %2 = vector.broadcast %cst : f32 to vector<64x16xf32>
    %3 = vector.extract_strided_slice %1 {offsets = [0, 0, 0], sizes = [8, 9, 12], strides = [1, 1, 1]} : vector<9x9x12xbf16> to vector<8x9x12xbf16>
    %4 = vector.extract_strided_slice %3 {offsets = [0, 0, 0], sizes = [8, 8, 12], strides = [1, 1, 1]} : vector<8x9x12xbf16> to vector<8x8x12xbf16>
    %5 = vector.extract_strided_slice %3 {offsets = [0, 1, 0], sizes = [8, 8, 12], strides = [1, 1, 1]} : vector<8x9x12xbf16> to vector<8x8x12xbf16>
    %6 = tpu.concatenate %4, %5 in 2 : vector<8x8x12xbf16>, vector<8x8x12xbf16> -> vector<8x8x24xbf16>
    %7 = vector.shape_cast %6 : vector<8x8x24xbf16> to vector<64x24xbf16>
    %c0_3 = arith.constant 0 : index
    %c0_4 = arith.constant 0 : index
    %c0_5 = arith.constant 0 : index
    %8 = vector.load %arg2[%c0_3, %c0_4, %c0_5] : memref<2x24x16xbf16, #tpu.memory_space<vmem>>, vector<1x24x16xbf16>
    %9 = vector.shape_cast %8 : vector<1x24x16xbf16> to vector<24x16xbf16>
    %cst_6 = arith.constant dense<0.000000e+00> : vector<64x16xf32>
    %10 = tpu.matmul %7, %9, %cst_6 {dimension_numbers = #tpu.dot_dimension_numbers<[1], [0], [0], [1], [0, 0, 1, 1], [], []>} : vector<64x24xbf16>, vector<24x16xbf16>, vector<64x16xf32> -> vector<64x16xf32>
    %11 = arith.addf %2, %10 : vector<64x16xf32>
    %12 = vector.extract_strided_slice %1 {offsets = [1, 0, 0], sizes = [8, 9, 12], strides = [1, 1, 1]} : vector<9x9x12xbf16> to vector<8x9x12xbf16>
    %13 = vector.extract_strided_slice %12 {offsets = [0, 0, 0], sizes = [8, 8, 12], strides = [1, 1, 1]} : vector<8x9x12xbf16> to vector<8x8x12xbf16>
    %14 = vector.extract_strided_slice %12 {offsets = [0, 1, 0], sizes = [8, 8, 12], strides = [1, 1, 1]} : vector<8x9x12xbf16> to vector<8x8x12xbf16>
    %15 = tpu.concatenate %13, %14 in 2 : vector<8x8x12xbf16>, vector<8x8x12xbf16> -> vector<8x8x24xbf16>
    %16 = vector.shape_cast %15 : vector<8x8x24xbf16> to vector<64x24xbf16>
    %c1 = arith.constant 1 : index
    %c0_7 = arith.constant 0 : index
    %c0_8 = arith.constant 0 : index
    %17 = vector.load %arg2[%c1, %c0_7, %c0_8] : memref<2x24x16xbf16, #tpu.memory_space<vmem>>, vector<1x24x16xbf16>
    %18 = vector.shape_cast %17 : vector<1x24x16xbf16> to vector<24x16xbf16>
    %cst_9 = arith.constant dense<0.000000e+00> : vector<64x16xf32>
    %19 = tpu.matmul %16, %18, %cst_9 {dimension_numbers = #tpu.dot_dimension_numbers<[1], [0], [0], [1], [0, 0, 1, 1], [], []>} : vector<64x24xbf16>, vector<24x16xbf16>, vector<64x16xf32> -> vector<64x16xf32>
    %20 = arith.addf %11, %19 : vector<64x16xf32>
    %c0_10 = arith.constant 0 : index
    %c0_11 = arith.constant 0 : index
    %21 = vector.load %arg3[%c0_10, %c0_11] : memref<1x16xf32, #tpu.memory_space<vmem>>, vector<1x16xf32>
    %22 = vector.broadcast %21 : vector<1x16xf32> to vector<64x16xf32>
    %23 = arith.addf %20, %22 : vector<64x16xf32>
    %cst_12 = arith.constant 0.000000e+00 : f32
    %24 = vector.broadcast %cst_12 : f32 to vector<64x16xf32>
    %25 = arith.maximumf %23, %24 : vector<64x16xf32>
    %26 = vector.shape_cast %25 : vector<64x16xf32> to vector<8x8x16xf32>
    %cst_13 = arith.constant 0.000000e+00 : bf16
    %27 = vector.broadcast %cst_13 : bf16 to vector<10x10x16xbf16>
    %c0_14 = arith.constant 0 : index
    %c0_15 = arith.constant 0 : index
    %c0_16 = arith.constant 0 : index
    %c0_17 = arith.constant 0 : index
    %28 = vector.load %arg4[%c0_14, %c0_15, %c0_16, %c0_17] : memref<1x10x10x16xbf16, #tpu.memory_space<vmem>>, vector<1x10x10x16xbf16>
    %29 = vector.shape_cast %28 : vector<1x10x10x16xbf16> to vector<10x10x16xbf16>
    %30 = vector.shape_cast %27 : vector<10x10x16xbf16> to vector<1x10x10x16xbf16>
    tpu.vector_store %arg4[%c0_14, %c0_15, %c0_16, %c0_17], %30 {strides = array<i32>} : memref<1x10x10x16xbf16, #tpu.memory_space<vmem>>, vector<1x10x10x16xbf16>,
    %31 = arith.truncf %26 : vector<8x8x16xf32> to vector<8x8x16xbf16>
    %c0_18 = arith.constant 0 : index
    %c1_19 = arith.constant 1 : index
    %c1_20 = arith.constant 1 : index
    %c0_21 = arith.constant 0 : index
    %32 = vector.load %arg4[%c0_18, %c1_19, %c1_20, %c0_21] : memref<1x10x10x16xbf16, #tpu.memory_space<vmem>>, vector<1x8x8x16xbf16>
    %33 = vector.shape_cast %32 : vector<1x8x8x16xbf16> to vector<8x8x16xbf16>
    %34 = vector.shape_cast %31 : vector<8x8x16xbf16> to vector<1x8x8x16xbf16>
    tpu.vector_store %arg4[%c0_18, %c1_19, %c1_20, %c0_21], %34 {strides = array<i32>} : memref<1x10x10x16xbf16, #tpu.memory_space<vmem>>, vector<1x8x8x16xbf16>,
    return
  }
  func.func @transform_0(%arg0: i32) -> (i32, i32, i32, i32) {
    %c0_i32 = arith.constant 0 : i32
    %c0_i32_0 = arith.constant 0 : i32
    %c0_i32_1 = arith.constant 0 : i32
    %c0_i32_2 = arith.constant 0 : i32
    return %arg0, %c0_i32, %c0_i32_0, %c0_i32_1 : i32, i32, i32, i32
  }
  func.func @transform_1(%arg0: i32) -> (i32, i32, i32) {
    %c0_i32 = arith.constant 0 : i32
    %c0_i32_0 = arith.constant 0 : i32
    %c0_i32_1 = arith.constant 0 : i32
    %c0_i32_2 = arith.constant 0 : i32
    return %c0_i32, %c0_i32_0, %c0_i32_1 : i32, i32, i32
  }
  func.func @transform_2(%arg0: i32) -> (i32, i32) {
    %c0_i32 = arith.constant 0 : i32
    %c0_i32_0 = arith.constant 0 : i32
    %c0_i32_1 = arith.constant 0 : i32
    return %c0_i32, %c0_i32_0 : i32, i32
  }
  func.func @transform_3(%arg0: i32) -> (i32, i32, i32, i32) {
    %c0_i32 = arith.constant 0 : i32
    %c0_i32_0 = arith.constant 0 : i32
    %c0_i32_1 = arith.constant 0 : i32
    %c0_i32_2 = arith.constant 0 : i32
    return %arg0, %c0_i32, %c0_i32_0, %c0_i32_1 : i32, i32, i32, i32
  }
}

module attributes {stable_mosaic.version = 11 : i64} {
  func.func @_conv4x4s2_kernel(%arg0: i32, %arg1: memref<1x5x5x64xbf16, #tpu.memory_space<vmem>>, %arg2: memref<2x128x32xbf16, #tpu.memory_space<vmem>>, %arg3: memref<1x32xf32, #tpu.memory_space<vmem>>, %arg4: memref<1x6x6x32xbf16, #tpu.memory_space<vmem>>) attributes {dimension_semantics = [#tpu.dimension_semantics<parallel>], iteration_bounds = array<i64: 2>, scalar_prefetch = 0 : i64, scratch_operands = 0 : i64, tpu.core_type = #tpu.core_type<tc>, window_params = [{transform_indices = @transform_0, window_bounds = array<i64: 1, 5, 5, 64>}, {pipeline_mode = #tpu.pipeline_mode<synchronous>, transform_indices = @transform_1, window_bounds = array<i64: 2, 128, 32>}, {pipeline_mode = #tpu.pipeline_mode<synchronous>, transform_indices = @transform_2, window_bounds = array<i64: 1, 32>}, {transform_indices = @transform_3, window_bounds = array<i64: 1, 6, 6, 32>}]} {
    %c0 = arith.constant 0 : index
    %c0_0 = arith.constant 0 : index
    %c0_1 = arith.constant 0 : index
    %c0_2 = arith.constant 0 : index
    %0 = vector.load %arg1[%c0, %c0_0, %c0_1, %c0_2] : memref<1x5x5x64xbf16, #tpu.memory_space<vmem>>, vector<1x5x5x64xbf16>
    %1 = vector.shape_cast %0 : vector<1x5x5x64xbf16> to vector<5x5x64xbf16>
    %cst = arith.constant 0.000000e+00 : f32
    %2 = vector.broadcast %cst : f32 to vector<16x32xf32>
    %3 = vector.extract_strided_slice %1 {offsets = [0, 0, 0], sizes = [4, 5, 64], strides = [1, 1, 1]} : vector<5x5x64xbf16> to vector<4x5x64xbf16>
    %4 = vector.extract_strided_slice %3 {offsets = [0, 0, 0], sizes = [4, 4, 64], strides = [1, 1, 1]} : vector<4x5x64xbf16> to vector<4x4x64xbf16>
    %5 = vector.extract_strided_slice %3 {offsets = [0, 1, 0], sizes = [4, 4, 64], strides = [1, 1, 1]} : vector<4x5x64xbf16> to vector<4x4x64xbf16>
    %6 = tpu.concatenate %4, %5 in 2 : vector<4x4x64xbf16>, vector<4x4x64xbf16> -> vector<4x4x128xbf16>
    %7 = vector.shape_cast %6 : vector<4x4x128xbf16> to vector<16x128xbf16>
    %c0_3 = arith.constant 0 : index
    %c0_4 = arith.constant 0 : index
    %c0_5 = arith.constant 0 : index
    %8 = vector.load %arg2[%c0_3, %c0_4, %c0_5] : memref<2x128x32xbf16, #tpu.memory_space<vmem>>, vector<1x128x32xbf16>
    %9 = vector.shape_cast %8 : vector<1x128x32xbf16> to vector<128x32xbf16>
    %cst_6 = arith.constant dense<0.000000e+00> : vector<16x32xf32>
    %10 = tpu.matmul %7, %9, %cst_6 {dimension_numbers = #tpu.dot_dimension_numbers<[1], [0], [0], [1], [0, 0, 1, 1], [], []>} : vector<16x128xbf16>, vector<128x32xbf16>, vector<16x32xf32> -> vector<16x32xf32>
    %11 = arith.addf %2, %10 : vector<16x32xf32>
    %12 = vector.extract_strided_slice %1 {offsets = [1, 0, 0], sizes = [4, 5, 64], strides = [1, 1, 1]} : vector<5x5x64xbf16> to vector<4x5x64xbf16>
    %13 = vector.extract_strided_slice %12 {offsets = [0, 0, 0], sizes = [4, 4, 64], strides = [1, 1, 1]} : vector<4x5x64xbf16> to vector<4x4x64xbf16>
    %14 = vector.extract_strided_slice %12 {offsets = [0, 1, 0], sizes = [4, 4, 64], strides = [1, 1, 1]} : vector<4x5x64xbf16> to vector<4x4x64xbf16>
    %15 = tpu.concatenate %13, %14 in 2 : vector<4x4x64xbf16>, vector<4x4x64xbf16> -> vector<4x4x128xbf16>
    %16 = vector.shape_cast %15 : vector<4x4x128xbf16> to vector<16x128xbf16>
    %c1 = arith.constant 1 : index
    %c0_7 = arith.constant 0 : index
    %c0_8 = arith.constant 0 : index
    %17 = vector.load %arg2[%c1, %c0_7, %c0_8] : memref<2x128x32xbf16, #tpu.memory_space<vmem>>, vector<1x128x32xbf16>
    %18 = vector.shape_cast %17 : vector<1x128x32xbf16> to vector<128x32xbf16>
    %cst_9 = arith.constant dense<0.000000e+00> : vector<16x32xf32>
    %19 = tpu.matmul %16, %18, %cst_9 {dimension_numbers = #tpu.dot_dimension_numbers<[1], [0], [0], [1], [0, 0, 1, 1], [], []>} : vector<16x128xbf16>, vector<128x32xbf16>, vector<16x32xf32> -> vector<16x32xf32>
    %20 = arith.addf %11, %19 : vector<16x32xf32>
    %c0_10 = arith.constant 0 : index
    %c0_11 = arith.constant 0 : index
    %21 = vector.load %arg3[%c0_10, %c0_11] : memref<1x32xf32, #tpu.memory_space<vmem>>, vector<1x32xf32>
    %22 = vector.broadcast %21 : vector<1x32xf32> to vector<16x32xf32>
    %23 = arith.addf %20, %22 : vector<16x32xf32>
    %cst_12 = arith.constant 0.000000e+00 : f32
    %24 = vector.broadcast %cst_12 : f32 to vector<16x32xf32>
    %25 = arith.maximumf %23, %24 : vector<16x32xf32>
    %26 = vector.shape_cast %25 : vector<16x32xf32> to vector<4x4x32xf32>
    %cst_13 = arith.constant 0.000000e+00 : bf16
    %27 = vector.broadcast %cst_13 : bf16 to vector<6x6x32xbf16>
    %c0_14 = arith.constant 0 : index
    %c0_15 = arith.constant 0 : index
    %c0_16 = arith.constant 0 : index
    %c0_17 = arith.constant 0 : index
    %28 = vector.load %arg4[%c0_14, %c0_15, %c0_16, %c0_17] : memref<1x6x6x32xbf16, #tpu.memory_space<vmem>>, vector<1x6x6x32xbf16>
    %29 = vector.shape_cast %28 : vector<1x6x6x32xbf16> to vector<6x6x32xbf16>
    %30 = vector.shape_cast %27 : vector<6x6x32xbf16> to vector<1x6x6x32xbf16>
    tpu.vector_store %arg4[%c0_14, %c0_15, %c0_16, %c0_17], %30 {strides = array<i32>} : memref<1x6x6x32xbf16, #tpu.memory_space<vmem>>, vector<1x6x6x32xbf16>,
    %31 = arith.truncf %26 : vector<4x4x32xf32> to vector<4x4x32xbf16>
    %c0_18 = arith.constant 0 : index
    %c1_19 = arith.constant 1 : index
    %c1_20 = arith.constant 1 : index
    %c0_21 = arith.constant 0 : index
    %32 = vector.load %arg4[%c0_18, %c1_19, %c1_20, %c0_21] : memref<1x6x6x32xbf16, #tpu.memory_space<vmem>>, vector<1x4x4x32xbf16>
    %33 = vector.shape_cast %32 : vector<1x4x4x32xbf16> to vector<4x4x32xbf16>
    %34 = vector.shape_cast %31 : vector<4x4x32xbf16> to vector<1x4x4x32xbf16>
    tpu.vector_store %arg4[%c0_18, %c1_19, %c1_20, %c0_21], %34 {strides = array<i32>} : memref<1x6x6x32xbf16, #tpu.memory_space<vmem>>, vector<1x4x4x32xbf16>,
    return
  }
  func.func @transform_0(%arg0: i32) -> (i32, i32, i32, i32) {
    %c0_i32 = arith.constant 0 : i32
    %c0_i32_0 = arith.constant 0 : i32
    %c0_i32_1 = arith.constant 0 : i32
    %c0_i32_2 = arith.constant 0 : i32
    return %arg0, %c0_i32, %c0_i32_0, %c0_i32_1 : i32, i32, i32, i32
  }
  func.func @transform_1(%arg0: i32) -> (i32, i32, i32) {
    %c0_i32 = arith.constant 0 : i32
    %c0_i32_0 = arith.constant 0 : i32
    %c0_i32_1 = arith.constant 0 : i32
    %c0_i32_2 = arith.constant 0 : i32
    return %c0_i32, %c0_i32_0, %c0_i32_1 : i32, i32, i32
  }
  func.func @transform_2(%arg0: i32) -> (i32, i32) {
    %c0_i32 = arith.constant 0 : i32
    %c0_i32_0 = arith.constant 0 : i32
    %c0_i32_1 = arith.constant 0 : i32
    return %c0_i32, %c0_i32_0 : i32, i32
  }
  func.func @transform_3(%arg0: i32) -> (i32, i32, i32, i32) {
    %c0_i32 = arith.constant 0 : i32
    %c0_i32_0 = arith.constant 0 : i32
    %c0_i32_1 = arith.constant 0 : i32
    %c0_i32_2 = arith.constant 0 : i32
    return %arg0, %c0_i32, %c0_i32_0, %c0_i32_1 : i32, i32, i32, i32
  }
}

module attributes {stable_mosaic.version = 11 : i64} {
  func.func @_conv3x3_kernel(%arg0: i32, %arg1: memref<1x6x6x32xbf16, #tpu.memory_space<vmem>>, %arg2: memref<3x96x32xbf16, #tpu.memory_space<vmem>>, %arg3: memref<1x32xf32, #tpu.memory_space<vmem>>, %arg4: memref<1x6x6x32xbf16, #tpu.memory_space<vmem>>) attributes {dimension_semantics = [#tpu.dimension_semantics<parallel>], iteration_bounds = array<i64: 2>, scalar_prefetch = 0 : i64, scratch_operands = 0 : i64, tpu.core_type = #tpu.core_type<tc>, window_params = [{transform_indices = @transform_0, window_bounds = array<i64: 1, 6, 6, 32>}, {pipeline_mode = #tpu.pipeline_mode<synchronous>, transform_indices = @transform_1, window_bounds = array<i64: 3, 96, 32>}, {pipeline_mode = #tpu.pipeline_mode<synchronous>, transform_indices = @transform_2, window_bounds = array<i64: 1, 32>}, {transform_indices = @transform_3, window_bounds = array<i64: 1, 6, 6, 32>}]} {
    %c0 = arith.constant 0 : index
    %c0_0 = arith.constant 0 : index
    %c0_1 = arith.constant 0 : index
    %c0_2 = arith.constant 0 : index
    %0 = vector.load %arg1[%c0, %c0_0, %c0_1, %c0_2] : memref<1x6x6x32xbf16, #tpu.memory_space<vmem>>, vector<1x6x6x32xbf16>
    %1 = vector.shape_cast %0 : vector<1x6x6x32xbf16> to vector<6x6x32xbf16>
    %cst = arith.constant 0.000000e+00 : f32
    %2 = vector.broadcast %cst : f32 to vector<16x32xf32>
    %3 = vector.extract_strided_slice %1 {offsets = [0, 0, 0], sizes = [4, 6, 32], strides = [1, 1, 1]} : vector<6x6x32xbf16> to vector<4x6x32xbf16>
    %4 = vector.extract_strided_slice %3 {offsets = [0, 0, 0], sizes = [4, 4, 32], strides = [1, 1, 1]} : vector<4x6x32xbf16> to vector<4x4x32xbf16>
    %5 = vector.extract_strided_slice %3 {offsets = [0, 1, 0], sizes = [4, 4, 32], strides = [1, 1, 1]} : vector<4x6x32xbf16> to vector<4x4x32xbf16>
    %6 = vector.extract_strided_slice %3 {offsets = [0, 2, 0], sizes = [4, 4, 32], strides = [1, 1, 1]} : vector<4x6x32xbf16> to vector<4x4x32xbf16>
    %7 = tpu.concatenate %4, %5, %6 in 2 : vector<4x4x32xbf16>, vector<4x4x32xbf16>, vector<4x4x32xbf16> -> vector<4x4x96xbf16>
    %8 = vector.shape_cast %7 : vector<4x4x96xbf16> to vector<16x96xbf16>
    %c0_3 = arith.constant 0 : index
    %c0_4 = arith.constant 0 : index
    %c0_5 = arith.constant 0 : index
    %9 = vector.load %arg2[%c0_3, %c0_4, %c0_5] : memref<3x96x32xbf16, #tpu.memory_space<vmem>>, vector<1x96x32xbf16>
    %10 = vector.shape_cast %9 : vector<1x96x32xbf16> to vector<96x32xbf16>
    %cst_6 = arith.constant dense<0.000000e+00> : vector<16x32xf32>
    %11 = tpu.matmul %8, %10, %cst_6 {dimension_numbers = #tpu.dot_dimension_numbers<[1], [0], [0], [1], [0, 0, 1, 1], [], []>} : vector<16x96xbf16>, vector<96x32xbf16>, vector<16x32xf32> -> vector<16x32xf32>
    %12 = arith.addf %2, %11 : vector<16x32xf32>
    %13 = vector.extract_strided_slice %1 {offsets = [1, 0, 0], sizes = [4, 6, 32], strides = [1, 1, 1]} : vector<6x6x32xbf16> to vector<4x6x32xbf16>
    %14 = vector.extract_strided_slice %13 {offsets = [0, 0, 0], sizes = [4, 4, 32], strides = [1, 1, 1]} : vector<4x6x32xbf16> to vector<4x4x32xbf16>
    %15 = vector.extract_strided_slice %13 {offsets = [0, 1, 0], sizes = [4, 4, 32], strides = [1, 1, 1]} : vector<4x6x32xbf16> to vector<4x4x32xbf16>
    %16 = vector.extract_strided_slice %13 {offsets = [0, 2, 0], sizes = [4, 4, 32], strides = [1, 1, 1]} : vector<4x6x32xbf16> to vector<4x4x32xbf16>
    %17 = tpu.concatenate %14, %15, %16 in 2 : vector<4x4x32xbf16>, vector<4x4x32xbf16>, vector<4x4x32xbf16> -> vector<4x4x96xbf16>
    %18 = vector.shape_cast %17 : vector<4x4x96xbf16> to vector<16x96xbf16>
    %c1 = arith.constant 1 : index
    %c0_7 = arith.constant 0 : index
    %c0_8 = arith.constant 0 : index
    %19 = vector.load %arg2[%c1, %c0_7, %c0_8] : memref<3x96x32xbf16, #tpu.memory_space<vmem>>, vector<1x96x32xbf16>
    %20 = vector.shape_cast %19 : vector<1x96x32xbf16> to vector<96x32xbf16>
    %cst_9 = arith.constant dense<0.000000e+00> : vector<16x32xf32>
    %21 = tpu.matmul %18, %20, %cst_9 {dimension_numbers = #tpu.dot_dimension_numbers<[1], [0], [0], [1], [0, 0, 1, 1], [], []>} : vector<16x96xbf16>, vector<96x32xbf16>, vector<16x32xf32> -> vector<16x32xf32>
    %22 = arith.addf %12, %21 : vector<16x32xf32>
    %23 = vector.extract_strided_slice %1 {offsets = [2, 0, 0], sizes = [4, 6, 32], strides = [1, 1, 1]} : vector<6x6x32xbf16> to vector<4x6x32xbf16>
    %24 = vector.extract_strided_slice %23 {offsets = [0, 0, 0], sizes = [4, 4, 32], strides = [1, 1, 1]} : vector<4x6x32xbf16> to vector<4x4x32xbf16>
    %25 = vector.extract_strided_slice %23 {offsets = [0, 1, 0], sizes = [4, 4, 32], strides = [1, 1, 1]} : vector<4x6x32xbf16> to vector<4x4x32xbf16>
    %26 = vector.extract_strided_slice %23 {offsets = [0, 2, 0], sizes = [4, 4, 32], strides = [1, 1, 1]} : vector<4x6x32xbf16> to vector<4x4x32xbf16>
    %27 = tpu.concatenate %24, %25, %26 in 2 : vector<4x4x32xbf16>, vector<4x4x32xbf16>, vector<4x4x32xbf16> -> vector<4x4x96xbf16>
    %28 = vector.shape_cast %27 : vector<4x4x96xbf16> to vector<16x96xbf16>
    %c2 = arith.constant 2 : index
    %c0_10 = arith.constant 0 : index
    %c0_11 = arith.constant 0 : index
    %29 = vector.load %arg2[%c2, %c0_10, %c0_11] : memref<3x96x32xbf16, #tpu.memory_space<vmem>>, vector<1x96x32xbf16>
    %30 = vector.shape_cast %29 : vector<1x96x32xbf16> to vector<96x32xbf16>
    %cst_12 = arith.constant dense<0.000000e+00> : vector<16x32xf32>
    %31 = tpu.matmul %28, %30, %cst_12 {dimension_numbers = #tpu.dot_dimension_numbers<[1], [0], [0], [1], [0, 0, 1, 1], [], []>} : vector<16x96xbf16>, vector<96x32xbf16>, vector<16x32xf32> -> vector<16x32xf32>
    %32 = arith.addf %22, %31 : vector<16x32xf32>
    %c0_13 = arith.constant 0 : index
    %c0_14 = arith.constant 0 : index
    %33 = vector.load %arg3[%c0_13, %c0_14] : memref<1x32xf32, #tpu.memory_space<vmem>>, vector<1x32xf32>
    %34 = vector.broadcast %33 : vector<1x32xf32> to vector<16x32xf32>
    %35 = arith.addf %32, %34 : vector<16x32xf32>
    %36 = vector.shape_cast %35 : vector<16x32xf32> to vector<4x4x32xf32>
    %cst_15 = arith.constant 0.000000e+00 : bf16
    %37 = vector.broadcast %cst_15 : bf16 to vector<6x6x32xbf16>
    %c0_16 = arith.constant 0 : index
    %c0_17 = arith.constant 0 : index
    %c0_18 = arith.constant 0 : index
    %c0_19 = arith.constant 0 : index
    %38 = vector.load %arg4[%c0_16, %c0_17, %c0_18, %c0_19] : memref<1x6x6x32xbf16, #tpu.memory_space<vmem>>, vector<1x6x6x32xbf16>
    %39 = vector.shape_cast %38 : vector<1x6x6x32xbf16> to vector<6x6x32xbf16>
    %40 = vector.shape_cast %37 : vector<6x6x32xbf16> to vector<1x6x6x32xbf16>
    tpu.vector_store %arg4[%c0_16, %c0_17, %c0_18, %c0_19], %40 {strides = array<i32>} : memref<1x6x6x32xbf16, #tpu.memory_space<vmem>>, vector<1x6x6x32xbf16>,
    %41 = arith.truncf %36 : vector<4x4x32xf32> to vector<4x4x32xbf16>
    %c0_20 = arith.constant 0 : index
    %c1_21 = arith.constant 1 : index
    %c1_22 = arith.constant 1 : index
    %c0_23 = arith.constant 0 : index
    %42 = vector.load %arg4[%c0_20, %c1_21, %c1_22, %c0_23] : memref<1x6x6x32xbf16, #tpu.memory_space<vmem>>, vector<1x4x4x32xbf16>
    %43 = vector.shape_cast %42 : vector<1x4x4x32xbf16> to vector<4x4x32xbf16>
    %44 = vector.shape_cast %41 : vector<4x4x32xbf16> to vector<1x4x4x32xbf16>
    tpu.vector_store %arg4[%c0_20, %c1_21, %c1_22, %c0_23], %44 {strides = array<i32>} : memref<1x6x6x32xbf16, #tpu.memory_space<vmem>>, vector<1x4x4x32xbf16>,
    return
  }
  func.func @transform_0(%arg0: i32) -> (i32, i32, i32, i32) {
    %c0_i32 = arith.constant 0 : i32
    %c0_i32_0 = arith.constant 0 : i32
    %c0_i32_1 = arith.constant 0 : i32
    %c0_i32_2 = arith.constant 0 : i32
    return %arg0, %c0_i32, %c0_i32_0, %c0_i32_1 : i32, i32, i32, i32
  }
  func.func @transform_1(%arg0: i32) -> (i32, i32, i32) {
    %c0_i32 = arith.constant 0 : i32
    %c0_i32_0 = arith.constant 0 : i32
    %c0_i32_1 = arith.constant 0 : i32
    %c0_i32_2 = arith.constant 0 : i32
    return %c0_i32, %c0_i32_0, %c0_i32_1 : i32, i32, i32
  }
  func.func @transform_2(%arg0: i32) -> (i32, i32) {
    %c0_i32 = arith.constant 0 : i32
    %c0_i32_0 = arith.constant 0 : i32
    %c0_i32_1 = arith.constant 0 : i32
    return %c0_i32, %c0_i32_0 : i32, i32
  }
  func.func @transform_3(%arg0: i32) -> (i32, i32, i32, i32) {
    %c0_i32 = arith.constant 0 : i32
    %c0_i32_0 = arith.constant 0 : i32
    %c0_i32_1 = arith.constant 0 : i32
    %c0_i32_2 = arith.constant 0 : i32
    return %arg0, %c0_i32, %c0_i32_0, %c0_i32_1 : i32, i32, i32, i32
  }
}

module attributes {stable_mosaic.version = 11 : i64} {
  func.func @_residual_kernel(%arg0: i32, %arg1: memref<1x6x6x32xbf16, #tpu.memory_space<vmem>>, %arg2: memref<3x96x8xbf16, #tpu.memory_space<vmem>>, %arg3: memref<8x32xbf16, #tpu.memory_space<vmem>>, %arg4: memref<1x6x6x32xbf16, #tpu.memory_space<vmem>>) attributes {dimension_semantics = [#tpu.dimension_semantics<parallel>], iteration_bounds = array<i64: 2>, scalar_prefetch = 0 : i64, scratch_operands = 0 : i64, tpu.core_type = #tpu.core_type<tc>, window_params = [{transform_indices = @transform_0, window_bounds = array<i64: 1, 6, 6, 32>}, {pipeline_mode = #tpu.pipeline_mode<synchronous>, transform_indices = @transform_1, window_bounds = array<i64: 3, 96, 8>}, {pipeline_mode = #tpu.pipeline_mode<synchronous>, transform_indices = @transform_2, window_bounds = array<i64: 8, 32>}, {transform_indices = @transform_3, window_bounds = array<i64: 1, 6, 6, 32>}]} {
    %c0 = arith.constant 0 : index
    %c0_0 = arith.constant 0 : index
    %c0_1 = arith.constant 0 : index
    %c0_2 = arith.constant 0 : index
    %0 = vector.load %arg1[%c0, %c0_0, %c0_1, %c0_2] : memref<1x6x6x32xbf16, #tpu.memory_space<vmem>>, vector<1x6x6x32xbf16>
    %1 = vector.shape_cast %0 : vector<1x6x6x32xbf16> to vector<6x6x32xbf16>
    %cst = arith.constant 0.000000e+00 : bf16
    %2 = vector.broadcast %cst : bf16 to vector<6x6x32xbf16>
    %3 = arith.maximumf %1, %2 : vector<6x6x32xbf16>
    %cst_3 = arith.constant 0.000000e+00 : f32
    %4 = vector.broadcast %cst_3 : f32 to vector<16x8xf32>
    %5 = vector.extract_strided_slice %3 {offsets = [0, 0, 0], sizes = [4, 6, 32], strides = [1, 1, 1]} : vector<6x6x32xbf16> to vector<4x6x32xbf16>
    %6 = vector.extract_strided_slice %5 {offsets = [0, 0, 0], sizes = [4, 4, 32], strides = [1, 1, 1]} : vector<4x6x32xbf16> to vector<4x4x32xbf16>
    %7 = vector.extract_strided_slice %5 {offsets = [0, 1, 0], sizes = [4, 4, 32], strides = [1, 1, 1]} : vector<4x6x32xbf16> to vector<4x4x32xbf16>
    %8 = vector.extract_strided_slice %5 {offsets = [0, 2, 0], sizes = [4, 4, 32], strides = [1, 1, 1]} : vector<4x6x32xbf16> to vector<4x4x32xbf16>
    %9 = tpu.concatenate %6, %7, %8 in 2 : vector<4x4x32xbf16>, vector<4x4x32xbf16>, vector<4x4x32xbf16> -> vector<4x4x96xbf16>
    %10 = vector.shape_cast %9 : vector<4x4x96xbf16> to vector<16x96xbf16>
    %c0_4 = arith.constant 0 : index
    %c0_5 = arith.constant 0 : index
    %c0_6 = arith.constant 0 : index
    %11 = vector.load %arg2[%c0_4, %c0_5, %c0_6] : memref<3x96x8xbf16, #tpu.memory_space<vmem>>, vector<1x96x8xbf16>
    %12 = vector.shape_cast %11 : vector<1x96x8xbf16> to vector<96x8xbf16>
    %cst_7 = arith.constant dense<0.000000e+00> : vector<16x8xf32>
    %13 = tpu.matmul %10, %12, %cst_7 {dimension_numbers = #tpu.dot_dimension_numbers<[1], [0], [0], [1], [0, 0, 1, 1], [], []>} : vector<16x96xbf16>, vector<96x8xbf16>, vector<16x8xf32> -> vector<16x8xf32>
    %14 = arith.addf %4, %13 : vector<16x8xf32>
    %15 = vector.extract_strided_slice %3 {offsets = [1, 0, 0], sizes = [4, 6, 32], strides = [1, 1, 1]} : vector<6x6x32xbf16> to vector<4x6x32xbf16>
    %16 = vector.extract_strided_slice %15 {offsets = [0, 0, 0], sizes = [4, 4, 32], strides = [1, 1, 1]} : vector<4x6x32xbf16> to vector<4x4x32xbf16>
    %17 = vector.extract_strided_slice %15 {offsets = [0, 1, 0], sizes = [4, 4, 32], strides = [1, 1, 1]} : vector<4x6x32xbf16> to vector<4x4x32xbf16>
    %18 = vector.extract_strided_slice %15 {offsets = [0, 2, 0], sizes = [4, 4, 32], strides = [1, 1, 1]} : vector<4x6x32xbf16> to vector<4x4x32xbf16>
    %19 = tpu.concatenate %16, %17, %18 in 2 : vector<4x4x32xbf16>, vector<4x4x32xbf16>, vector<4x4x32xbf16> -> vector<4x4x96xbf16>
    %20 = vector.shape_cast %19 : vector<4x4x96xbf16> to vector<16x96xbf16>
    %c1 = arith.constant 1 : index
    %c0_8 = arith.constant 0 : index
    %c0_9 = arith.constant 0 : index
    %21 = vector.load %arg2[%c1, %c0_8, %c0_9] : memref<3x96x8xbf16, #tpu.memory_space<vmem>>, vector<1x96x8xbf16>
    %22 = vector.shape_cast %21 : vector<1x96x8xbf16> to vector<96x8xbf16>
    %cst_10 = arith.constant dense<0.000000e+00> : vector<16x8xf32>
    %23 = tpu.matmul %20, %22, %cst_10 {dimension_numbers = #tpu.dot_dimension_numbers<[1], [0], [0], [1], [0, 0, 1, 1], [], []>} : vector<16x96xbf16>, vector<96x8xbf16>, vector<16x8xf32> -> vector<16x8xf32>
    %24 = arith.addf %14, %23 : vector<16x8xf32>
    %25 = vector.extract_strided_slice %3 {offsets = [2, 0, 0], sizes = [4, 6, 32], strides = [1, 1, 1]} : vector<6x6x32xbf16> to vector<4x6x32xbf16>
    %26 = vector.extract_strided_slice %25 {offsets = [0, 0, 0], sizes = [4, 4, 32], strides = [1, 1, 1]} : vector<4x6x32xbf16> to vector<4x4x32xbf16>
    %27 = vector.extract_strided_slice %25 {offsets = [0, 1, 0], sizes = [4, 4, 32], strides = [1, 1, 1]} : vector<4x6x32xbf16> to vector<4x4x32xbf16>
    %28 = vector.extract_strided_slice %25 {offsets = [0, 2, 0], sizes = [4, 4, 32], strides = [1, 1, 1]} : vector<4x6x32xbf16> to vector<4x4x32xbf16>
    %29 = tpu.concatenate %26, %27, %28 in 2 : vector<4x4x32xbf16>, vector<4x4x32xbf16>, vector<4x4x32xbf16> -> vector<4x4x96xbf16>
    %30 = vector.shape_cast %29 : vector<4x4x96xbf16> to vector<16x96xbf16>
    %c2 = arith.constant 2 : index
    %c0_11 = arith.constant 0 : index
    %c0_12 = arith.constant 0 : index
    %31 = vector.load %arg2[%c2, %c0_11, %c0_12] : memref<3x96x8xbf16, #tpu.memory_space<vmem>>, vector<1x96x8xbf16>
    %32 = vector.shape_cast %31 : vector<1x96x8xbf16> to vector<96x8xbf16>
    %cst_13 = arith.constant dense<0.000000e+00> : vector<16x8xf32>
    %33 = tpu.matmul %30, %32, %cst_13 {dimension_numbers = #tpu.dot_dimension_numbers<[1], [0], [0], [1], [0, 0, 1, 1], [], []>} : vector<16x96xbf16>, vector<96x8xbf16>, vector<16x8xf32> -> vector<16x8xf32>
    %34 = arith.addf %24, %33 : vector<16x8xf32>
    %cst_14 = arith.constant 0.000000e+00 : f32
    %35 = vector.broadcast %cst_14 : f32 to vector<16x8xf32>
    %36 = arith.maximumf %34, %35 : vector<16x8xf32>
    %37 = arith.truncf %36 : vector<16x8xf32> to vector<16x8xbf16>
    %c0_15 = arith.constant 0 : index
    %c0_16 = arith.constant 0 : index
    %38 = vector.load %arg3[%c0_15, %c0_16] : memref<8x32xbf16, #tpu.memory_space<vmem>>, vector<8x32xbf16>
    %cst_17 = arith.constant dense<0.000000e+00> : vector<16x32xf32>
    %39 = tpu.matmul %37, %38, %cst_17 {dimension_numbers = #tpu.dot_dimension_numbers<[1], [0], [0], [1], [0, 0, 1, 1], [], []>} : vector<16x8xbf16>, vector<8x32xbf16>, vector<16x32xf32> -> vector<16x32xf32>
    %40 = vector.shape_cast %39 : vector<16x32xf32> to vector<4x4x32xf32>
    %41 = vector.extract_strided_slice %1 {offsets = [1, 1, 0], sizes = [4, 4, 32], strides = [1, 1, 1]} : vector<6x6x32xbf16> to vector<4x4x32xbf16>
    %42 = arith.extf %41 : vector<4x4x32xbf16> to vector<4x4x32xf32>
    %43 = arith.addf %42, %40 : vector<4x4x32xf32>
    %cst_18 = arith.constant 0.000000e+00 : bf16
    %44 = vector.broadcast %cst_18 : bf16 to vector<6x6x32xbf16>
    %c0_19 = arith.constant 0 : index
    %c0_20 = arith.constant 0 : index
    %c0_21 = arith.constant 0 : index
    %c0_22 = arith.constant 0 : index
    %45 = vector.load %arg4[%c0_19, %c0_20, %c0_21, %c0_22] : memref<1x6x6x32xbf16, #tpu.memory_space<vmem>>, vector<1x6x6x32xbf16>
    %46 = vector.shape_cast %45 : vector<1x6x6x32xbf16> to vector<6x6x32xbf16>
    %47 = vector.shape_cast %44 : vector<6x6x32xbf16> to vector<1x6x6x32xbf16>
    tpu.vector_store %arg4[%c0_19, %c0_20, %c0_21, %c0_22], %47 {strides = array<i32>} : memref<1x6x6x32xbf16, #tpu.memory_space<vmem>>, vector<1x6x6x32xbf16>,
    %48 = arith.truncf %43 : vector<4x4x32xf32> to vector<4x4x32xbf16>
    %c0_23 = arith.constant 0 : index
    %c1_24 = arith.constant 1 : index
    %c1_25 = arith.constant 1 : index
    %c0_26 = arith.constant 0 : index
    %49 = vector.load %arg4[%c0_23, %c1_24, %c1_25, %c0_26] : memref<1x6x6x32xbf16, #tpu.memory_space<vmem>>, vector<1x4x4x32xbf16>
    %50 = vector.shape_cast %49 : vector<1x4x4x32xbf16> to vector<4x4x32xbf16>
    %51 = vector.shape_cast %48 : vector<4x4x32xbf16> to vector<1x4x4x32xbf16>
    tpu.vector_store %arg4[%c0_23, %c1_24, %c1_25, %c0_26], %51 {strides = array<i32>} : memref<1x6x6x32xbf16, #tpu.memory_space<vmem>>, vector<1x4x4x32xbf16>,
    return
  }
  func.func @transform_0(%arg0: i32) -> (i32, i32, i32, i32) {
    %c0_i32 = arith.constant 0 : i32
    %c0_i32_0 = arith.constant 0 : i32
    %c0_i32_1 = arith.constant 0 : i32
    %c0_i32_2 = arith.constant 0 : i32
    return %arg0, %c0_i32, %c0_i32_0, %c0_i32_1 : i32, i32, i32, i32
  }
  func.func @transform_1(%arg0: i32) -> (i32, i32, i32) {
    %c0_i32 = arith.constant 0 : i32
    %c0_i32_0 = arith.constant 0 : i32
    %c0_i32_1 = arith.constant 0 : i32
    %c0_i32_2 = arith.constant 0 : i32
    return %c0_i32, %c0_i32_0, %c0_i32_1 : i32, i32, i32
  }
  func.func @transform_2(%arg0: i32) -> (i32, i32) {
    %c0_i32 = arith.constant 0 : i32
    %c0_i32_0 = arith.constant 0 : i32
    %c0_i32_1 = arith.constant 0 : i32
    return %c0_i32, %c0_i32_0 : i32, i32
  }
  func.func @transform_3(%arg0: i32) -> (i32, i32, i32, i32) {
    %c0_i32 = arith.constant 0 : i32
    %c0_i32_0 = arith.constant 0 : i32
    %c0_i32_1 = arith.constant 0 : i32
    %c0_i32_2 = arith.constant 0 : i32
    return %arg0, %c0_i32, %c0_i32_0, %c0_i32_1 : i32, i32, i32, i32
  }
}

module attributes {stable_mosaic.version = 11 : i64} {
  func.func @_residual_kernel(%arg0: i32, %arg1: memref<1x6x6x32xbf16, #tpu.memory_space<vmem>>, %arg2: memref<3x96x8xbf16, #tpu.memory_space<vmem>>, %arg3: memref<8x32xbf16, #tpu.memory_space<vmem>>, %arg4: memref<1x4x4x32xf32, #tpu.memory_space<vmem>>) attributes {dimension_semantics = [#tpu.dimension_semantics<parallel>], iteration_bounds = array<i64: 2>, scalar_prefetch = 0 : i64, scratch_operands = 0 : i64, tpu.core_type = #tpu.core_type<tc>, window_params = [{transform_indices = @transform_0, window_bounds = array<i64: 1, 6, 6, 32>}, {pipeline_mode = #tpu.pipeline_mode<synchronous>, transform_indices = @transform_1, window_bounds = array<i64: 3, 96, 8>}, {pipeline_mode = #tpu.pipeline_mode<synchronous>, transform_indices = @transform_2, window_bounds = array<i64: 8, 32>}, {transform_indices = @transform_3, window_bounds = array<i64: 1, 4, 4, 32>}]} {
    %c0 = arith.constant 0 : index
    %c0_0 = arith.constant 0 : index
    %c0_1 = arith.constant 0 : index
    %c0_2 = arith.constant 0 : index
    %0 = vector.load %arg1[%c0, %c0_0, %c0_1, %c0_2] : memref<1x6x6x32xbf16, #tpu.memory_space<vmem>>, vector<1x6x6x32xbf16>
    %1 = vector.shape_cast %0 : vector<1x6x6x32xbf16> to vector<6x6x32xbf16>
    %cst = arith.constant 0.000000e+00 : bf16
    %2 = vector.broadcast %cst : bf16 to vector<6x6x32xbf16>
    %3 = arith.maximumf %1, %2 : vector<6x6x32xbf16>
    %cst_3 = arith.constant 0.000000e+00 : f32
    %4 = vector.broadcast %cst_3 : f32 to vector<16x8xf32>
    %5 = vector.extract_strided_slice %3 {offsets = [0, 0, 0], sizes = [4, 6, 32], strides = [1, 1, 1]} : vector<6x6x32xbf16> to vector<4x6x32xbf16>
    %6 = vector.extract_strided_slice %5 {offsets = [0, 0, 0], sizes = [4, 4, 32], strides = [1, 1, 1]} : vector<4x6x32xbf16> to vector<4x4x32xbf16>
    %7 = vector.extract_strided_slice %5 {offsets = [0, 1, 0], sizes = [4, 4, 32], strides = [1, 1, 1]} : vector<4x6x32xbf16> to vector<4x4x32xbf16>
    %8 = vector.extract_strided_slice %5 {offsets = [0, 2, 0], sizes = [4, 4, 32], strides = [1, 1, 1]} : vector<4x6x32xbf16> to vector<4x4x32xbf16>
    %9 = tpu.concatenate %6, %7, %8 in 2 : vector<4x4x32xbf16>, vector<4x4x32xbf16>, vector<4x4x32xbf16> -> vector<4x4x96xbf16>
    %10 = vector.shape_cast %9 : vector<4x4x96xbf16> to vector<16x96xbf16>
    %c0_4 = arith.constant 0 : index
    %c0_5 = arith.constant 0 : index
    %c0_6 = arith.constant 0 : index
    %11 = vector.load %arg2[%c0_4, %c0_5, %c0_6] : memref<3x96x8xbf16, #tpu.memory_space<vmem>>, vector<1x96x8xbf16>
    %12 = vector.shape_cast %11 : vector<1x96x8xbf16> to vector<96x8xbf16>
    %cst_7 = arith.constant dense<0.000000e+00> : vector<16x8xf32>
    %13 = tpu.matmul %10, %12, %cst_7 {dimension_numbers = #tpu.dot_dimension_numbers<[1], [0], [0], [1], [0, 0, 1, 1], [], []>} : vector<16x96xbf16>, vector<96x8xbf16>, vector<16x8xf32> -> vector<16x8xf32>
    %14 = arith.addf %4, %13 : vector<16x8xf32>
    %15 = vector.extract_strided_slice %3 {offsets = [1, 0, 0], sizes = [4, 6, 32], strides = [1, 1, 1]} : vector<6x6x32xbf16> to vector<4x6x32xbf16>
    %16 = vector.extract_strided_slice %15 {offsets = [0, 0, 0], sizes = [4, 4, 32], strides = [1, 1, 1]} : vector<4x6x32xbf16> to vector<4x4x32xbf16>
    %17 = vector.extract_strided_slice %15 {offsets = [0, 1, 0], sizes = [4, 4, 32], strides = [1, 1, 1]} : vector<4x6x32xbf16> to vector<4x4x32xbf16>
    %18 = vector.extract_strided_slice %15 {offsets = [0, 2, 0], sizes = [4, 4, 32], strides = [1, 1, 1]} : vector<4x6x32xbf16> to vector<4x4x32xbf16>
    %19 = tpu.concatenate %16, %17, %18 in 2 : vector<4x4x32xbf16>, vector<4x4x32xbf16>, vector<4x4x32xbf16> -> vector<4x4x96xbf16>
    %20 = vector.shape_cast %19 : vector<4x4x96xbf16> to vector<16x96xbf16>
    %c1 = arith.constant 1 : index
    %c0_8 = arith.constant 0 : index
    %c0_9 = arith.constant 0 : index
    %21 = vector.load %arg2[%c1, %c0_8, %c0_9] : memref<3x96x8xbf16, #tpu.memory_space<vmem>>, vector<1x96x8xbf16>
    %22 = vector.shape_cast %21 : vector<1x96x8xbf16> to vector<96x8xbf16>
    %cst_10 = arith.constant dense<0.000000e+00> : vector<16x8xf32>
    %23 = tpu.matmul %20, %22, %cst_10 {dimension_numbers = #tpu.dot_dimension_numbers<[1], [0], [0], [1], [0, 0, 1, 1], [], []>} : vector<16x96xbf16>, vector<96x8xbf16>, vector<16x8xf32> -> vector<16x8xf32>
    %24 = arith.addf %14, %23 : vector<16x8xf32>
    %25 = vector.extract_strided_slice %3 {offsets = [2, 0, 0], sizes = [4, 6, 32], strides = [1, 1, 1]} : vector<6x6x32xbf16> to vector<4x6x32xbf16>
    %26 = vector.extract_strided_slice %25 {offsets = [0, 0, 0], sizes = [4, 4, 32], strides = [1, 1, 1]} : vector<4x6x32xbf16> to vector<4x4x32xbf16>
    %27 = vector.extract_strided_slice %25 {offsets = [0, 1, 0], sizes = [4, 4, 32], strides = [1, 1, 1]} : vector<4x6x32xbf16> to vector<4x4x32xbf16>
    %28 = vector.extract_strided_slice %25 {offsets = [0, 2, 0], sizes = [4, 4, 32], strides = [1, 1, 1]} : vector<4x6x32xbf16> to vector<4x4x32xbf16>
    %29 = tpu.concatenate %26, %27, %28 in 2 : vector<4x4x32xbf16>, vector<4x4x32xbf16>, vector<4x4x32xbf16> -> vector<4x4x96xbf16>
    %30 = vector.shape_cast %29 : vector<4x4x96xbf16> to vector<16x96xbf16>
    %c2 = arith.constant 2 : index
    %c0_11 = arith.constant 0 : index
    %c0_12 = arith.constant 0 : index
    %31 = vector.load %arg2[%c2, %c0_11, %c0_12] : memref<3x96x8xbf16, #tpu.memory_space<vmem>>, vector<1x96x8xbf16>
    %32 = vector.shape_cast %31 : vector<1x96x8xbf16> to vector<96x8xbf16>
    %cst_13 = arith.constant dense<0.000000e+00> : vector<16x8xf32>
    %33 = tpu.matmul %30, %32, %cst_13 {dimension_numbers = #tpu.dot_dimension_numbers<[1], [0], [0], [1], [0, 0, 1, 1], [], []>} : vector<16x96xbf16>, vector<96x8xbf16>, vector<16x8xf32> -> vector<16x8xf32>
    %34 = arith.addf %24, %33 : vector<16x8xf32>
    %cst_14 = arith.constant 0.000000e+00 : f32
    %35 = vector.broadcast %cst_14 : f32 to vector<16x8xf32>
    %36 = arith.maximumf %34, %35 : vector<16x8xf32>
    %37 = arith.truncf %36 : vector<16x8xf32> to vector<16x8xbf16>
    %c0_15 = arith.constant 0 : index
    %c0_16 = arith.constant 0 : index
    %38 = vector.load %arg3[%c0_15, %c0_16] : memref<8x32xbf16, #tpu.memory_space<vmem>>, vector<8x32xbf16>
    %cst_17 = arith.constant dense<0.000000e+00> : vector<16x32xf32>
    %39 = tpu.matmul %37, %38, %cst_17 {dimension_numbers = #tpu.dot_dimension_numbers<[1], [0], [0], [1], [0, 0, 1, 1], [], []>} : vector<16x8xbf16>, vector<8x32xbf16>, vector<16x32xf32> -> vector<16x32xf32>
    %40 = vector.shape_cast %39 : vector<16x32xf32> to vector<4x4x32xf32>
    %41 = vector.extract_strided_slice %1 {offsets = [1, 1, 0], sizes = [4, 4, 32], strides = [1, 1, 1]} : vector<6x6x32xbf16> to vector<4x4x32xbf16>
    %42 = arith.extf %41 : vector<4x4x32xbf16> to vector<4x4x32xf32>
    %43 = arith.addf %42, %40 : vector<4x4x32xf32>
    %cst_18 = arith.constant 0.000000e+00 : f32
    %44 = vector.broadcast %cst_18 : f32 to vector<4x4x32xf32>
    %45 = arith.maximumf %43, %44 : vector<4x4x32xf32>
    %c0_19 = arith.constant 0 : index
    %c0_20 = arith.constant 0 : index
    %c0_21 = arith.constant 0 : index
    %c0_22 = arith.constant 0 : index
    %46 = vector.load %arg4[%c0_19, %c0_20, %c0_21, %c0_22] : memref<1x4x4x32xf32, #tpu.memory_space<vmem>>, vector<1x4x4x32xf32>
    %47 = vector.shape_cast %46 : vector<1x4x4x32xf32> to vector<4x4x32xf32>
    %48 = vector.shape_cast %45 : vector<4x4x32xf32> to vector<1x4x4x32xf32>
    tpu.vector_store %arg4[%c0_19, %c0_20, %c0_21, %c0_22], %48 {strides = array<i32>} : memref<1x4x4x32xf32, #tpu.memory_space<vmem>>, vector<1x4x4x32xf32>,
    return
  }
  func.func @transform_0(%arg0: i32) -> (i32, i32, i32, i32) {
    %c0_i32 = arith.constant 0 : i32
    %c0_i32_0 = arith.constant 0 : i32
    %c0_i32_1 = arith.constant 0 : i32
    %c0_i32_2 = arith.constant 0 : i32
    return %arg0, %c0_i32, %c0_i32_0, %c0_i32_1 : i32, i32, i32, i32
  }
  func.func @transform_1(%arg0: i32) -> (i32, i32, i32) {
    %c0_i32 = arith.constant 0 : i32
    %c0_i32_0 = arith.constant 0 : i32
    %c0_i32_1 = arith.constant 0 : i32
    %c0_i32_2 = arith.constant 0 : i32
    return %c0_i32, %c0_i32_0, %c0_i32_1 : i32, i32, i32
  }
  func.func @transform_2(%arg0: i32) -> (i32, i32) {
    %c0_i32 = arith.constant 0 : i32
    %c0_i32_0 = arith.constant 0 : i32
    %c0_i32_1 = arith.constant 0 : i32
    return %c0_i32, %c0_i32_0 : i32, i32
  }
  func.func @transform_3(%arg0: i32) -> (i32, i32, i32, i32) {
    %c0_i32 = arith.constant 0 : i32
    %c0_i32_0 = arith.constant 0 : i32
    %c0_i32_1 = arith.constant 0 : i32
    %c0_i32_2 = arith.constant 0 : i32
    return %arg0, %c0_i32, %c0_i32_0, %c0_i32_1 : i32, i32, i32, i32
  }
}

</mosaic_0001>

<bundles_post_ra>
// kernel: _encoder_forward.5
= control target key start
LH: loop header
LB: loop body
LE: loop exit
PB: predicated region body
PF: predicated region fallthrough
CT: control target
= control target key end

     0   :  { %s1007_s12 = smov 0   ;;  %s1255_s0 = inlined_call_operand.vmem [shape: bf16[2,9,9,12], index: 0, kind: input, shape index: {}]   ;;  %s1256_s1 = inlined_call_operand.vmem [shape: bf16[2,24,16], index: 1, kind: input, shape index: {}]   ;;  %s1257_s2 = inlined_call_operand.vmem [shape: f32[1,16], index: 2, kind: input, shape index: {}]   ;;  %s1258_s3 = inlined_call_operand.vmem [shape: bf16[2,10,10,16], index: 3, kind: output, shape index: {}]  }
   0x1 LB: > { %s824_s13 = sadd.s32 4294967295, %s983_s12   ;;  %p828_p0 = scmp.ge.s32.totalorder %s983_s12, 1  ;;  %s983_s12 = sphi %s1007_s12, %s13_s12  }
   0x2   : > { %p137_p1 = scmp.lt.s32.totalorder %s983_s12, 3 }
   0x4   : > { %p138_p2 = pnand %p828_p0, %p137_p1 }
   0x5   : > { %p161_p3 = scmp.lt.s32.totalorder (!%p138_p2), %s824_s13, 1  ;;  %s985_s26 = smov (!%p138_p2), 12  }
   0x6   : > { %141 = sbr.rel (%p138_p2) target bundleno = 379 (0x17b), region = 32 }
   0xb   : > { %s1264_s13 = smov (!%p161_p3, %s824_s13), 1  ;;  %v973_v0 = vld [vmem:[%s1256_s1 + $0x8] ss:$0 sps:$4 sm:$0xff]   ;;  %vm393_vm0 = vcmask 1043456   ;;  %v974_v2 = vld [vmem:[%s1256_s1 + $0x14] ss:$0 sps:$4 sm:$0xff]  }
   0xc   : > { %s952_s16 = smul.u32 72, %s1264_s13  ;;  %951 = vmatprep.subr.msk.bf16.mxu1 %vm393_vm0, %v973_v0  ;;  %v490_v1 = vsel %vm393_vm0, %v973_v0, 0  ;;  %950 = vmatprep.subr.msk.bf16.mxu0 %vm393_vm0, %v974_v2  ;;  %v975_v3 = vld [vmem:[%s1256_s1] sm:$0xff]   ;;  %v976_v40 = vld [vmem:[%s1256_s1 + $0xc] sm:$0xff]   ;;  %v395_v54 = vsel %vm393_vm0, %v974_v2, 0  ;;  %vm302_vm1 = vcmask 97280  }
   0xd   : > { %939 = vmatpush3.bf16.msra.mxu1 %v490_v1  ;;  %927 = vmatpush3.bf16.msra.mxu0 %v395_v54  ;;  %vm380_vm2 = vcmask 195584   ;;  %s953_s27 = smul.u32 80, %s1264_s13  ;;  %vm580_vm3 = vcmask 125952   ;;  %vm582_vm4 = vcmask 122880   ;;  %vm716_vm5 = vsmask.f32 7938 }
   0xe   : > { %s1029_s21 = scalar_lea.vmem %s1255_s0, %s952_s16  ;;  %940 = vmatprep.subr.bf16.mxu1 %v975_v3  ;;  %928 = vmatprep.subr.bf16.mxu0 %v976_v40  ;;  %vm722_vm6 = vsmask.f32 256  ;;  %vm1175_vm7 = vmand %vm580_vm3, %vm716_vm5 }
   0xf   : > { %v1036_v4 = vld [vmem:[%s1029_s21 + $0x10] sm:$0xf]  ;;  %v177_v5 = vld [vmem:[%s1029_s21 + $0x14] sm:$0x1]  ;;  %v1040_v6 = vld [vmem:[%s1029_s21] sm:$0xf]  ;;  %s1123_s30 = scalar_lea.vmem %s1258_s3, %s953_s27 }
  0x10   : > { %v833_v7 = vcombine.low %v1036_v4, %v177_v5  ;;  %v173_v8 = vld [vmem:[%s1029_s21 + $0x4] sm:$0x1]  ;;  %v1045_v9 = vld [vmem:[%s1029_s21 + $0x18] sm:$0xf]  ;;  %v179_v10 = vld [vmem:[%s1029_s21 + $0x1c] sm:$0x1] }
  0x11   : > { %v831_v11 = vcombine.low %v1040_v6, %v173_v8  ;;  %v834_v12 = vcombine.low %v1045_v9, %v179_v10  ;;  %v1051_v13 = vld [vmem:[%s1029_s21 + $0x8] sm:$0xf]  ;;  %v175_v14 = vld [vmem:[%s1029_s21 + $0xc] sm:$0x1]  ;;  %941 = vmatpush3.bf16.msra.mxu1 %v975_v3  ;;  %v1060_v20 = vld [vmem:[%s1029_s21 + $0x20] sm:$0xf]  ;;  %929 = vmatpush3.bf16.msra.mxu0 %v976_v40 }
  0x12   : > { %v1055_v15 = vld [vmem:[%s1029_s21 + $0x28] sm:$0xf]  ;;  %v245_v16 = vshrl.u32 %v833_v7, 16  ;;  %v247_v17 = vshll.u32 %v833_v7, 16  ;;  %v832_v18 = vcombine.low %v1051_v13, %v175_v14  ;;  %v183_v19 = vld [vmem:[%s1029_s21 + $0x2c] sm:$0x1]  ;;  %vm1180_vm8 = vmand %vm582_vm4, %vm722_vm6 }
  0x13   : > { %v231_v21 = vshrl.u32 %v831_v11, 16  ;;  %v233_v22 = vshll.u32 %v831_v11, 16  ;;  %v252_v23 = vshrl.u32 %v834_v12, 16  ;;  %v254_v24 = vshll.u32 %v834_v12, 16  ;;  %v181_v25 = vld [vmem:[%s1029_s21 + $0x24] sm:$0x1] }
  0x14   : > { %v249_v26 = vrot.slane %v247_v17, 1  ;;  %v238_v27 = vshrl.u32 %v832_v18, 16  ;;  %v240_v28 = vshll.u32 %v832_v18, 16  ;;  %v836_v29 = vcombine.low %v1055_v15, %v183_v19  ;;  %v1065_v30 = vld [vmem:[%s1029_s21 + $0x38] sm:$0xf] }
  0x15   : > { %v235_v31 = vrot.slane %v233_v22, 1  ;;  %v256_v32 = vrot.slane %v254_v24, 1  ;;  %v835_v33 = vcombine.low %v1060_v20, %v181_v25  ;;  %v187_v34 = vld [vmem:[%s1029_s21 + $0x3c] sm:$0x1]  ;;  %v1070_v35 = vld [vmem:[%s1029_s21 + $0x30] sm:$0xf] }
  0x16   : > { %v250_v36 = vor.u32 %v249_v26, %v245_v16  ;;  %v242_v37 = vrot.slane %v240_v28, 1  ;;  %v268_v38 = vshll.u32 %v836_v29, 16  ;;  %v185_v39 = vld [vmem:[%s1029_s21 + $0x34] sm:$0x1]  ;;  %v266_v43 = vshrl.u32 %v836_v29, 16 }
  0x17   : > { %v236_v41 = vor.u32 %v235_v31, %v231_v21  ;;  %v257_v42 = vor.u32 %v256_v32, %v252_v23  ;;  %v261_v44 = vshll.u32 %v835_v33, 16  ;;  %v1077_v45 = vld [vmem:[%s1029_s21 + $0x40] sm:$0xf]  ;;  %v189_v46 = vld [vmem:[%s1029_s21 + $0x44] sm:$0x1]  ;;  %v259_v48 = vshrl.u32 %v835_v33, 16 }
  0x18   : > { %290 = vrot.lane.b32.xlu1 %v250_v36, %s985_s26  ;;  %v270_v47 = vrot.slane %v268_v38, 1  ;;  %v838_v49 = vcombine.low %v1065_v30, %v187_v34  ;;  %v837_v50 = vcombine.low %v1070_v35, %v185_v39  ;;  %v243_v51 = vor.u32 %v242_v37, %v238_v27 }
  0x19   : > { %286 = vrot.lane.b32.xlu0 %v236_v41, %s985_s26  ;;  %v263_v52 = vrot.slane %v261_v44, 1  ;;  %v839_v53 = vcombine.low %v1077_v45, %v189_v46 }
  0x1a   : > { %v282_v55 = vshll.u32 %v838_v49, 16  ;;  %v275_v56 = vshll.u32 %v837_v50, 16  ;;  %v271_v57 = vor.u32 %v270_v47, %v266_v43  ;;  %v280_v58 = vshrl.u32 %v838_v49, 16 }
  0x1b   : > { %v264_v60 = vor.u32 %v263_v52, %v259_v48  ;;  %v273_v61 = vshrl.u32 %v837_v50, 16  ;;  %v338_v63 = vshll.u32 %v839_v53, 16  ;;  %v336_v2 = vshrl.u32 %v839_v53, 16 }
  0x1c   : > { %292 = vrot.lane.b32.xlu1 %v257_v42, %s985_s26  ;;  %v284_v59 = vrot.slane %v282_v55, 1  ;;  %v277_v62 = vrot.slane %v275_v56, 1 }
  0x1d   : > { %288 = vrot.lane.b32.xlu0 %v243_v51, %s985_s26  ;;  %v340_v3 = vrot.slane %v338_v63, 1 }
  0x1e   : > { %v285_v0 = vor.u32 %v284_v59, %v280_v58  ;;  %v278_v1 = vor.u32 %v277_v62, %v273_v61 }
  0x1f   : > { %v341_v5 = vor.u32 %v340_v3, %v336_v2 }
  0x20   : > { %296 = vrot.lane.b32.xlu1 %v271_v57, %s985_s26 }
  0x21   : > { %294 = vrot.lane.b32.xlu0 %v264_v60, %s985_s26 }
  0x24   : > { %300 = vrot.lane.b32.xlu1 %v285_v0, %s985_s26 }
  0x25   : > { %298 = vrot.lane.b32.xlu0 %v278_v1, %s985_s26 }
  0x29   : > { %342 = vrot.lane.b32.xlu0 %v341_v5, %s985_s26 }
  0x8a   : > { %v291_v7 = vpop.permute.xlu1 %290 }
  0x8b   : > { %v287_v8 = vpop.permute.xlu0 %286  ;;  %v311_v10 = vsel %vm302_vm1, %v1036_v4, %v291_v7 }
  0x8c   : > { %v305_v16 = vsel %vm302_vm1, %v1040_v6, %v287_v8 }
  0x8e   : > { %v293_v11 = vpop.permute.xlu1 %292 }
  0x8f   : > { %v314_v12 = vsel %vm302_vm1, %v1045_v9, %v293_v11  ;;  %v289_v14 = vpop.permute.xlu0 %288 }
  0x90   : > { %v854_v17 = vcombine.low %v311_v10, %v314_v12  ;;  %v308_v18 = vsel %vm302_vm1, %v1051_v13, %v289_v14 }
  0x91   : > { %v843_v19 = vcombine.low %v308_v18, %v311_v10  ;;  %v853_v21 = vcombine.low %v305_v16, %v308_v18 }
  0x92   : > { %v297_v22 = vpop.permute.xlu1 %296 }
  0x93   : > { %v320_v23 = vsel %vm302_vm1, %v1055_v15, %v297_v22  ;;  %930 = vmatprep.mubr.msk.bf16.mxu0 %vm380_vm2, %v843_v19  ;;  %942 = vmatprep.mubr.msk.bf16.mxu1 %vm380_vm2, %v853_v21  ;;  %v295_v4 = vpop.permute.xlu0 %294 }
  0x94   : > { %v317_v9 = vsel %vm302_vm1, %v1060_v20, %v295_v4  ;;  %943 = vmatmul.mubr.msk.bf16.vlgmr.msra.gmra.mxu1 %vm380_vm2, %v854_v17 }
  0x95   : > { %v844_v6 = vcombine.low %v314_v12, %v317_v9  ;;  %v855_v13 = vcombine.low %v317_v9, %v320_v23 }
  0x96   : > { %v301_v24 = vpop.permute.xlu1 %300 }
  0x97   : > { %v326_v25 = vsel %vm302_vm1, %v1065_v30, %v301_v24  ;;  %931 = vmatmul.mubr.msk.bf16.vlgmr.msra.gmra.mxu0 %vm380_vm2, %v844_v6  ;;  %946 = vmatprep.mubr.msk.bf16.mxu1 %vm380_vm2, %v855_v13  ;;  %v299_v15 = vpop.permute.xlu0 %298  ;;  %v986_v30 = vmov 0  }
  0x98   : > { %v323_v26 = vsel %vm302_vm1, %v1070_v35, %v299_v15  ;;  %581 = vst.msk [vmem:[%s1123_s30] sm:$0xf] %vm580_vm3, %v986_v30  ;;  %588 = vst.msk [vmem:[%s1123_s30 + $0x18] sm:$0xf] %vm580_vm3, %v986_v30  ;;  %v1168_v35 = vld [vmem:[%s1257_s2] ss:$0 sm:$0xff] }
  0x99   : > { %v845_v27 = vcombine.low %v320_v23, %v323_v26  ;;  %v856_v28 = vcombine.low %v323_v26, %v326_v25  ;;  %583 = vst.msk [vmem:[%s1123_s30 + $0x4] sm:$0x1] %vm582_vm4, %v986_v30  ;;  %589 = vst.msk [vmem:[%s1123_s30 + $0x1c] sm:$0x1] %vm582_vm4, %v986_v30 }
  0x9a   : > { %600 = vst.msk [vmem:[%s1123_s30 + $0x48] sm:$0xf] %vm580_vm3, %v986_v30  ;;  %584 = vst.msk [vmem:[%s1123_s30 + $0x8] sm:$0xf] %vm580_vm3, %v986_v30 }
  0x9b   : > { %934 = vmatprep.mubr.msk.bf16.mxu0 %vm380_vm2, %v845_v27  ;;  %v343_v20 = vpop.permute.xlu0 %342  ;;  %601 = vst.msk [vmem:[%s1123_s30 + $0x4c] sm:$0x1] %vm582_vm4, %v986_v30  ;;  %585 = vst.msk [vmem:[%s1123_s30 + $0xc] sm:$0x1] %vm582_vm4, %v986_v30 }
  0x9c   : > { %v346_v29 = vsel %vm302_vm1, %v1077_v45, %v343_v20  ;;  %947 = vmatmul.mubr.msk.bf16.gmra.mxu1 %vm380_vm2, %v856_v28  ;;  %586 = vst.msk [vmem:[%s1123_s30 + $0x10] sm:$0xf] %vm580_vm3, %v986_v30  ;;  %590 = vst.msk [vmem:[%s1123_s30 + $0x20] sm:$0xf] %vm580_vm3, %v986_v30 }
  0x9d   : > { %v846_v31 = vcombine.low %v326_v25, %v346_v29  ;;  %587 = vst.msk [vmem:[%s1123_s30 + $0x14] sm:$0x1] %vm582_vm4, %v986_v30  ;;  %591 = vst.msk [vmem:[%s1123_s30 + $0x24] sm:$0x1] %vm582_vm4, %v986_v30 }
  0x9e   : > { %592 = vst.msk [vmem:[%s1123_s30 + $0x28] sm:$0xf] %vm580_vm3, %v986_v30  ;;  %594 = vst.msk [vmem:[%s1123_s30 + $0x30] sm:$0xf] %vm580_vm3, %v986_v30 }
  0x9f   : > { %935 = vmatmul.mubr.msk.bf16.gmra.mxu0 %vm380_vm2, %v846_v31  ;;  %593 = vst.msk [vmem:[%s1123_s30 + $0x2c] sm:$0x1] %vm582_vm4, %v986_v30  ;;  %595 = vst.msk [vmem:[%s1123_s30 + $0x34] sm:$0x1] %vm582_vm4, %v986_v30  ;;  %v880_v2 = vld [vmem:[%s1123_s30 + $0x18] sm:$0xf] }
  0xa0   : > { %596 = vst.msk [vmem:[%s1123_s30 + $0x38] sm:$0xf] %vm580_vm3, %v986_v30  ;;  %598 = vst.msk [vmem:[%s1123_s30 + $0x40] sm:$0xf] %vm580_vm3, %v986_v30  ;;  %v882_v3 = vld [vmem:[%s1123_s30 + $0x1c] sm:$0x1] }
  0xa1   : > { %597 = vst.msk [vmem:[%s1123_s30 + $0x3c] sm:$0x1] %vm582_vm4, %v986_v30  ;;  %599 = vst.msk [vmem:[%s1123_s30 + $0x44] sm:$0x1] %vm582_vm4, %v986_v30  ;;  %v872_v18 = vld [vmem:[%s1123_s30 + $0x8] sm:$0xf] }
  0xa2   : > { %v874_v19 = vld [vmem:[%s1123_s30 + $0xc] sm:$0x1] }
  0xa3   : > { %v884_v30 = vld [vmem:[%s1123_s30 + $0x20] sm:$0xf] }
 0x154   : > { %v944_v32 = vpop.f32.mrf.mxu1 }
 0x156   : > { %v526_v33 = vpop.f32.mrf.mxu1 }
 0x157   : > { %v932_v34 = vpop.f32.mrf.mxu0 }
 0x158   : > { %v535_v36 = vadd.f32 %v944_v32, %v932_v34  ;;  %v945_v37 = vpop.f32.mrf.mxu1  ;;  %v886_v32 = vld [vmem:[%s1123_s30 + $0x24] sm:$0x1] }
 0x159   : > { %v431_v38 = vpop.f32.mrf.mxu0 }
 0x15a   : > { %v566_v39 = vadd.f32 %v1168_v35, %v535_v36  ;;  %v527_v40 = vadd.f32 %v526_v33, %v431_v38  ;;  %v529_v41 = vpop.f32.mrf.mxu1 }
 0x15b   : > { %v933_v42 = vpop.f32.mrf.mxu0 }
 0x15c   : > { %v574_v43 = vmax.f32 %v566_v39, 0.0  ;;  %v564_v44 = vadd.f32 %v1168_v35, %v527_v40  ;;  %v538_v45 = vadd.f32 %v945_v37, %v933_v42  ;;  %v948_v46 = vpop.f32.mrf.mxu1  ;;  %v878_v42 = vld [vmem:[%s1123_s30 + $0x14] sm:$0x1] }
 0x15d   : > { %v434_v47 = vpop.f32.mrf.mxu0 }
 0x15e   : > { %v908_v48 = vpack.c.bf16 %v574_v43, %v574_v43  ;;  %v572_v49 = vmax.f32 %v564_v44, 0.0  ;;  %v567_v50 = vadd.f32 %v1168_v35, %v538_v45  ;;  %v530_v51 = vadd.f32 %v529_v41, %v434_v47  ;;  %v542_v57 = vpop.f32.mrf.mxu1  ;;  %v876_v41 = vld [vmem:[%s1123_s30 + $0x10] sm:$0xf] }
 0x15f   : > { %v936_v52 = vpop.f32.mrf.mxu0 }
 0x160   : > { %v651_v53 = vshrl.u32 %v908_v48, 16  ;;  %v906_v54 = vpack.c.bf16 %v572_v49, %v572_v49  ;;  %v575_v55 = vmax.f32 %v567_v50, 0.0  ;;  %v565_v56 = vadd.f32 %v1168_v35, %v530_v51  ;;  %v949_v4 = vpop.f32.mrf.mxu1 }
 0x161   : > { %v551_v58 = vadd.f32 %v948_v46, %v936_v52  ;;  %v447_v59 = vpop.f32.mrf.mxu0  ;;  %v654_v61 = vshll.u32 %v908_v48, 16 }
 0x162   : > { %v653_v60 = vrot.slane %v651_v53, 7  ;;  %v635_v63 = vshrl.u32 %v906_v54, 16  ;;  %v909_v0 = vpack.c.bf16 %v575_v55, %v575_v55  ;;  %v638_v5 = vshll.u32 %v906_v54, 16  ;;  %v545_v40 = vpop.f32.mrf.mxu1 }
 0x163   : > { %v573_v7 = vmax.f32 %v565_v56, 0.0  ;;  %v570_v8 = vadd.f32 %v1168_v35, %v551_v58  ;;  %v543_v10 = vadd.f32 %v542_v57, %v447_v59  ;;  %v937_v11 = vpop.f32.mrf.mxu0  ;;  %v896_v56 = vld [vmem:[%s1123_s30 + $0x38] sm:$0xf]  ;;  %v898_v57 = vld [vmem:[%s1123_s30 + $0x3c] sm:$0x1] }
 0x164   : > { %v656_v12 = vor.u32 %v654_v61, %v653_v60  ;;  %v657_v14 = vrot.slane %v653_v60, 4  ;;  %v637_v16 = vrot.slane %v635_v63, 7  ;;  %v659_v17 = vshrl.u32 %v909_v0, 16 }
 0x165   : > { %v662_v21 = vshll.u32 %v909_v0, 16  ;;  %v907_v22 = vpack.c.bf16 %v573_v7, %v573_v7  ;;  %v578_v23 = vmax.f32 %v570_v8, 0.0  ;;  %v568_v9 = vadd.f32 %v1168_v35, %v543_v10  ;;  %v450_v20 = vpop.f32.mrf.mxu0 }
 0x166   : > { %v734_v6 = vsel %vm1175_vm7, %v656_v12, %v880_v2  ;;  %v737_v13 = vsel %vm1180_vm8, %v657_v14, %v882_v3  ;;  %v640_v24 = vor.u32 %v638_v5, %v637_v16  ;;  %v641_v25 = vrot.slane %v637_v16, 4  ;;  %v888_v2 = vld [vmem:[%s1123_s30 + $0x28] sm:$0xf]  ;;  %v890_v3 = vld [vmem:[%s1123_s30 + $0x2c] sm:$0x1] }
 0x167   : > { %881 = vst [vmem:[%s1123_s30 + $0x18] sm:$0xf] %v734_v6  ;;  %883 = vst [vmem:[%s1123_s30 + $0x1c] sm:$0x1] %v737_v13  ;;  %v661_v15 = vrot.slane %v659_v17, 7  ;;  %v643_v26 = vshrl.u32 %v907_v22, 16  ;;  %v912_v28 = vpack.c.bf16 %v578_v23, %v578_v23  ;;  %v554_v34 = vadd.f32 %v949_v4, %v937_v11 }
 0x168   : > { %v646_v27 = vshll.u32 %v907_v22, 16  ;;  %v719_v29 = vsel %vm1175_vm7, %v640_v24, %v872_v18  ;;  %v725_v31 = vsel %vm1180_vm8, %v641_v25, %v874_v19  ;;  %v576_v33 = vmax.f32 %v568_v9, 0.0  ;;  %v902_v22 = vld [vmem:[%s1123_s30 + $0x44] sm:$0x1]  ;;  %v892_v13 = vld [vmem:[%s1123_s30 + $0x30] sm:$0xf] }
 0x169   : > { %873 = vst [vmem:[%s1123_s30 + $0x8] sm:$0xf] %v719_v29  ;;  %875 = vst [vmem:[%s1123_s30 + $0xc] sm:$0x1] %v725_v31  ;;  %v664_v36 = vor.u32 %v662_v21, %v661_v15  ;;  %v665_v37 = vrot.slane %v661_v15, 4  ;;  %v645_v38 = vrot.slane %v643_v26, 7  ;;  %v571_v44 = vadd.f32 %v1168_v35, %v554_v34 }
 0x16a   : > { %v683_v39 = vshrl.u32 %v912_v28, 16  ;;  %v910_v43 = vpack.c.bf16 %v576_v33, %v576_v33  ;;  %v546_v45 = vadd.f32 %v545_v40, %v450_v20  ;;  %v686_v51 = vshll.u32 %v912_v28, 16  ;;  %v900_v21 = vld [vmem:[%s1123_s30 + $0x40] sm:$0xf]  ;;  %v894_v24 = vld [vmem:[%s1123_s30 + $0x34] sm:$0x1] }
 0x16b   : > { %v740_v46 = vsel %vm1175_vm7, %v664_v36, %v884_v30  ;;  %v743_v47 = vsel %vm1180_vm8, %v665_v37, %v886_v32  ;;  %v648_v48 = vor.u32 %v646_v27, %v645_v38  ;;  %v649_v49 = vrot.slane %v645_v38, 4 }
 0x16c   : > { %885 = vst [vmem:[%s1123_s30 + $0x20] sm:$0xf] %v740_v46  ;;  %887 = vst [vmem:[%s1123_s30 + $0x24] sm:$0x1] %v743_v47  ;;  %v685_v50 = vrot.slane %v683_v39, 7  ;;  %v667_v52 = vshrl.u32 %v910_v43, 16  ;;  %v569_v59 = vadd.f32 %v1168_v35, %v546_v45 }
 0x16d   : > { %v579_v53 = vmax.f32 %v571_v44, 0.0  ;;  %v728_v54 = vsel %vm1175_vm7, %v648_v48, %v876_v41  ;;  %v731_v55 = vsel %vm1180_vm8, %v649_v49, %v878_v42  ;;  %v670_v58 = vshll.u32 %v910_v43, 16 }
 0x16e   : > { %877 = vst [vmem:[%s1123_s30 + $0x10] sm:$0xf] %v728_v54  ;;  %879 = vst [vmem:[%s1123_s30 + $0x14] sm:$0x1] %v731_v55  ;;  %v688_v60 = vor.u32 %v686_v51, %v685_v50  ;;  %v689_v61 = vrot.slane %v685_v50, 4  ;;  %v669_v63 = vrot.slane %v667_v52, 7 }
 0x16f   : > { %v913_v0 = vpack.c.bf16 %v579_v53, %v579_v53  ;;  %v577_v5 = vmax.f32 %v569_v59, 0.0 }
 0x170   : > { %v758_v7 = vsel %vm1175_vm7, %v688_v60, %v896_v56  ;;  %v761_v8 = vsel %vm1180_vm8, %v689_v61, %v898_v57  ;;  %v672_v35 = vor.u32 %v670_v58, %v669_v63  ;;  %v673_v10 = vrot.slane %v669_v63, 4 }
 0x171   : > { %897 = vst [vmem:[%s1123_s30 + $0x38] sm:$0xf] %v758_v7  ;;  %899 = vst [vmem:[%s1123_s30 + $0x3c] sm:$0x1] %v761_v8  ;;  %v691_v11 = vshrl.u32 %v913_v0, 16  ;;  %v911_v12 = vpack.c.bf16 %v577_v5, %v577_v5  ;;  %v694_v18 = vshll.u32 %v913_v0, 16 }
 0x172   : > { %v746_v14 = vsel %vm1175_vm7, %v672_v35, %v888_v2  ;;  %v749_v16 = vsel %vm1180_vm8, %v673_v10, %v890_v3 }
 0x173   : > { %889 = vst [vmem:[%s1123_s30 + $0x28] sm:$0xf] %v746_v14  ;;  %891 = vst [vmem:[%s1123_s30 + $0x2c] sm:$0x1] %v749_v16  ;;  %v693_v17 = vrot.slane %v691_v11, 7  ;;  %v675_v19 = vshrl.u32 %v911_v12, 16 }
 0x174   : > { %v678_v6 = vshll.u32 %v911_v12, 16 }
 0x175   : > { %v696_v23 = vor.u32 %v694_v18, %v693_v17  ;;  %v697_v4 = vrot.slane %v693_v17, 4  ;;  %v677_v9 = vrot.slane %v675_v19, 7 }
 0x177   : > { %v764_v25 = vsel %vm1175_vm7, %v696_v23, %v900_v21  ;;  %v767_v15 = vsel %vm1180_vm8, %v697_v4, %v902_v22  ;;  %v680_v26 = vor.u32 %v678_v6, %v677_v9  ;;  %v681_v27 = vrot.slane %v677_v9, 4 }
 0x178   : > { %901 = vst [vmem:[%s1123_s30 + $0x40] sm:$0xf] %v764_v25  ;;  %903 = vst [vmem:[%s1123_s30 + $0x44] sm:$0x1] %v767_v15 }
 0x179   : > { %v752_v28 = vsel %vm1175_vm7, %v680_v26, %v892_v13  ;;  %v755_v20 = vsel %vm1180_vm8, %v681_v27, %v894_v24 }
 0x17a   : > { %893 = vst [vmem:[%s1123_s30 + $0x30] sm:$0xf] %v752_v28  ;;  %895 = vst [vmem:[%s1123_s30 + $0x34] sm:$0x1] %v755_v20 }
 0x17b PF: > { %s13_s12 = sadd.s32 1, %s983_s12  }
 0x17c   : > { %p10_p4 = scmp.ge.s32.totalorder %s13_s12, 4  }
 0x17e   :  { %12 = sbr.rel (!%p10_p4) target bundleno = 1 (0x1), region = 64 }

// kernel: _encoder_forward.6
= control target key start
LH: loop header
LB: loop body
LE: loop exit
PB: predicated region body
PF: predicated region fallthrough
CT: control target
= control target key end

     0   :  { %s838_s12 = smov 0   ;;  %s988_s0 = inlined_call_operand.vmem [shape: bf16[2,5,5,64], index: 0, kind: input, shape index: {}]   ;;  %s989_s1 = inlined_call_operand.vmem [shape: bf16[2,128,32], index: 1, kind: input, shape index: {}]   ;;  %s990_s2 = inlined_call_operand.vmem [shape: f32[1,32], index: 2, kind: input, shape index: {}]   ;;  %s991_s3 = inlined_call_operand.vmem [shape: bf16[2,6,6,32], index: 3, kind: output, shape index: {}]  }
   0x1 LB: > { %s648_s13 = sadd.s32 4294967295, %s811_s12   ;;  %p652_p0 = scmp.ge.s32.totalorder %s811_s12, 1  ;;  %s811_s12 = sphi %s838_s12, %s13_s12  }
   0x2   : > { %p137_p1 = scmp.lt.s32.totalorder %s811_s12, 3 }
   0x4   : > { %p138_p2 = pnand %p652_p0, %p137_p1 }
   0x5   : > { %p161_p3 = scmp.lt.s32.totalorder (!%p138_p2), %s648_s13, 1  ;;  %s814_s9 = smov (!%p138_p2), 64  }
   0x6   : > { %141 = sbr.rel (%p138_p2) target bundleno = 369 (0x171), region = 32 }
   0xb   : > { %v789_v0 = vld [vmem:[%s989_s1 + $0x38] sm:$0xff]   ;;  %v813_v1 = vmov 0.0   ;;  %s995_s13 = smov (!%p161_p3, %s648_s13), 1  ;;  %v791_v3 = vld [vmem:[%s989_s1 + $0x30] sm:$0xff]   ;;  %v793_v5 = vld [vmem:[%s989_s1 + $0x28] sm:$0xff]   ;;  %vm815_vm0 = vmmov 0   ;;  %v295_v49 = vlaneseq }
   0xc   : > { %749 = vmatprep.subr.bf16.mxu1 %v813_v1  ;;  %729 = vmatprep.subr.bf16.mxu0 %v813_v1  ;;  %v790_v2 = vld [vmem:[%s989_s1 + $0x78] sm:$0xff]   ;;  %s769_s20 = smul.u32 20, %s995_s13  ;;  %v792_v4 = vld [vmem:[%s989_s1 + $0x70] sm:$0xff]   ;;  %v794_v14 = vld [vmem:[%s989_s1 + $0x68] sm:$0xff]   ;;  %v816_v47 = vmov 1983009808  }
   0xd   : > { %750 = vmatpush3.bf16.msra.mxu1 %v789_v0  ;;  %730 = vmatpush3.bf16.msra.mxu0 %v790_v2  ;;  %v795_v17 = vld [vmem:[%s989_s1 + $0x20] sm:$0xff]   ;;  %v797_v34 = vld [vmem:[%s989_s1 + $0x18] sm:$0xff]   ;;  %v799_v40 = vld [vmem:[%s989_s1 + $0x10] sm:$0xff]   ;;  %v293_v48 = vunpack.c.l.s4 %v816_v47  ;;  %v296_v53 = vshrl.u32 %v295_v49, 7  ;;  %vm225_vm1 = vcmask 523264   ;;  %s770_s26 = smul.u32 24, %s995_s13 }
   0xe   : > { %751 = vmatprep.subr.bf16.mxu1 %v813_v1  ;;  %731 = vmatprep.subr.bf16.mxu0 %v813_v1  ;;  %s165_s25 = scalar_lea.vmem %s988_s0, %s769_s20  ;;  %v796_v29 = vld [vmem:[%s989_s1 + $0x60] sm:$0xff]   ;;  %v798_v39 = vld [vmem:[%s989_s1 + $0x58] sm:$0xff]   ;;  %v800_v42 = vld [vmem:[%s989_s1 + $0x50] sm:$0xff]   ;;  %vm522_vm2 = vcmask 256000   ;;  %vm579_vm3 = vsmask.f32 2306 }
   0xf   : > { %v871_v6 = vld [vmem:[%s165_s25 + $0x8] sm:$0x7]  ;;  %v873_v7 = vld [vmem:[%s165_s25] sm:$0x7]  ;;  %v875_v8 = vld [vmem:[%s165_s25 + $0xc] sm:$0x7]  ;;  %765 = vmatprep.mubr.msk.bf16.mxu1 %vm815_vm0, %v813_v1  ;;  %745 = vmatprep.mubr.msk.bf16.mxu0 %vm815_vm0, %v813_v1  ;;  %v294_v52 = vunpack.c.0.s8 %v293_v48  ;;  %s947_s29 = scalar_lea.vmem %s991_s3, %s770_s26 }
  0x10   : > { %v657_v9 = vcombine.low %v871_v6, %v871_v6  ;;  %v655_v10 = vcombine.low %v873_v7, %v873_v7  ;;  %v658_v11 = vcombine.low %v875_v8, %v875_v8  ;;  %v884_v12 = vld [vmem:[%s165_s25 + $0x4] sm:$0x7]  ;;  %v886_v13 = vld [vmem:[%s165_s25 + $0x10] sm:$0x7]  ;;  %v801_v43 = vld [vmem:[%s989_s1 + $0x8] sm:$0xff]  }
  0x11   : > { %752 = vmatpush3.bf16.msra.mxu1 %v791_v3  ;;  %732 = vmatpush3.bf16.msra.mxu0 %v792_v4  ;;  %v656_v15 = vcombine.low %v884_v12, %v884_v12  ;;  %v659_v16 = vcombine.low %v886_v13, %v886_v13  ;;  %v802_v44 = vld [vmem:[%s989_s1 + $0x48] sm:$0xff]   ;;  %v803_v45 = vld [vmem:[%s989_s1] sm:$0xff]   ;;  %v297_v55 = vsub.s32 %v294_v52, %v296_v53  ;;  %vm965_vm4 = vmand %vm522_vm2, %vm579_vm3 }
  0x12   : > { %753 = vmatprep.subr.bf16.mxu1 %v813_v1  ;;  %733 = vmatprep.subr.bf16.mxu0 %v813_v1  ;;  %v204_v18 = vshrl.u32 %v657_v9, 16  ;;  %v206_v19 = vshll.u32 %v657_v9, 16  ;;  %v190_v20 = vshrl.u32 %v655_v10, 16  ;;  %v192_v21 = vshll.u32 %v655_v10, 16  ;;  %v804_v46 = vld [vmem:[%s989_s1 + $0x40] sm:$0xff]  }
  0x13   : > { %v211_v22 = vshrl.u32 %v658_v11, 16  ;;  %v213_v23 = vshll.u32 %v658_v11, 16  ;;  %v199_v24 = vshll.u32 %v656_v15, 16  ;;  %v197_v27 = vshrl.u32 %v656_v15, 16 }
  0x14   : > { %v208_v25 = vrot.slane %v206_v19, 1  ;;  %v194_v26 = vrot.slane %v192_v21, 1  ;;  %v260_v28 = vshll.u32 %v659_v16, 16  ;;  %v258_v35 = vshrl.u32 %v659_v16, 16 }
  0x15   : > { %754 = vmatpush3.bf16.msra.mxu1 %v793_v5  ;;  %734 = vmatpush3.bf16.msra.mxu0 %v794_v14  ;;  %v215_v30 = vrot.slane %v213_v23, 1  ;;  %v201_v31 = vrot.slane %v199_v24, 1 }
  0x16   : > { %755 = vmatprep.subr.bf16.mxu1 %v813_v1  ;;  %735 = vmatprep.subr.bf16.mxu0 %v813_v1  ;;  %v209_v32 = vor.u32 %v208_v25, %v204_v18  ;;  %v195_v33 = vor.u32 %v194_v26, %v190_v20  ;;  %v262_v38 = vrot.slane %v260_v28, 1 }
  0x17   : > { %v216_v36 = vor.u32 %v215_v30, %v211_v22  ;;  %v202_v37 = vor.u32 %v201_v31, %v197_v27 }
  0x18   : > { %221 = vrot.lane.b32.xlu1 %v209_v32, %s814_s9  ;;  %217 = vrot.lane.b32.xlu0 %v195_v33, %s814_s9  ;;  %v263_v41 = vor.u32 %v262_v38, %v258_v35 }
  0x19   : > { %756 = vmatpush3.bf16.msra.mxu1 %v795_v17  ;;  %736 = vmatpush3.bf16.msra.mxu0 %v796_v29 }
  0x1a   : > { %757 = vmatprep.subr.bf16.mxu1 %v813_v1  ;;  %737 = vmatprep.subr.bf16.mxu0 %v813_v1 }
  0x1c   : > { %223 = vrot.lane.b32.xlu1 %v216_v36, %s814_s9  ;;  %219 = vrot.lane.b32.xlu0 %v202_v37, %s814_s9 }
  0x1d   : > { %758 = vmatpush3.bf16.msra.mxu1 %v797_v34  ;;  %738 = vmatpush3.bf16.msra.mxu0 %v798_v39 }
  0x1e   : > { %759 = vmatprep.subr.bf16.mxu1 %v813_v1  ;;  %739 = vmatprep.subr.bf16.mxu0 %v813_v1 }
  0x20   : > { %264 = vrot.lane.b32.xlu0 %v263_v41, %s814_s9 }
  0x21   : > { %760 = vmatpush3.bf16.msra.mxu1 %v799_v40  ;;  %740 = vmatpush3.bf16.msra.mxu0 %v800_v42 }
  0x22   : > { %761 = vmatprep.subr.bf16.mxu1 %v813_v1  ;;  %741 = vmatprep.subr.bf16.mxu0 %v813_v1 }
  0x25   : > { %762 = vmatpush3.bf16.msra.mxu1 %v801_v43  ;;  %742 = vmatpush3.bf16.msra.mxu0 %v802_v44 }
  0x26   : > { %763 = vmatprep.subr.bf16.mxu1 %v813_v1  ;;  %743 = vmatprep.subr.bf16.mxu0 %v813_v1 }
  0x29   : > { %764 = vmatpush3.bf16.msra.mxu1 %v803_v45  ;;  %744 = vmatpush3.bf16.msra.mxu0 %v804_v46 }
  0x8a   : > { %v222_v50 = vpop.permute.xlu1 %221  ;;  %v218_v51 = vpop.permute.xlu0 %217 }
  0x8b   : > { %v234_v54 = vsel %vm225_vm1, %v871_v6, %v222_v50  ;;  %v228_v58 = vsel %vm225_vm1, %v873_v7, %v218_v51  ;;  %v817_v7 = vmov 0  }
  0x8c   : > { %523 = vst.msk [vmem:[%s947_s29] sm:$0x7] %vm522_vm2, %v817_v7  ;;  %524 = vst.msk [vmem:[%s947_s29 + $0x4] sm:$0x7] %vm522_vm2, %v817_v7 }
  0x8d   : > { %525 = vst.msk [vmem:[%s947_s29 + $0x8] sm:$0x7] %vm522_vm2, %v817_v7  ;;  %528 = vst.msk [vmem:[%s947_s29 + $0x14] sm:$0x7] %vm522_vm2, %v817_v7 }
  0x8e   : > { %v224_v56 = vpop.permute.xlu1 %223  ;;  %v220_v57 = vpop.permute.xlu0 %219  ;;  %526 = vst.msk [vmem:[%s947_s29 + $0xc] sm:$0x7] %vm522_vm2, %v817_v7  ;;  %527 = vst.msk [vmem:[%s947_s29 + $0x10] sm:$0x7] %vm522_vm2, %v817_v7 }
  0x8f   : > { %v237_v59 = vsel %vm225_vm1, %v875_v8, %v224_v56  ;;  %v231_v60 = vsel %vm225_vm1, %v884_v12, %v220_v57 }
  0x90   : > { %v399_v61 = vcombine.low %v234_v54, %v237_v59  ;;  %v398_v62 = vcombine.low %v228_v58, %v231_v60  ;;  %v290_v0 = vcombine.low %v231_v60, %v234_v54 }
  0x92   : > { %v413_v63 = vrot.slane %v399_v61, %v297_v55  ;;  %v406_v1 = vrot.slane %v398_v62, %v297_v55  ;;  %v265_v2 = vpop.permute.xlu0 %264  ;;  %v298_v6 = vrot.slane %v290_v0, %v297_v55 }
  0x93   : > { %v268_v3 = vsel %vm225_vm1, %v886_v13, %v265_v2  ;;  %v692_v13 = vld [vmem:[%s990_s2] ss:$0 sm:$0xff]  ;;  %v697_v34 = vld [vmem:[%s947_s29 + $0x4] sm:$0x7] }
  0x94   : > { %v291_v4 = vcombine.low %v237_v59, %v268_v3  ;;  %v414_v5 = vcombine.low %v406_v1, %v413_v63  ;;  %v699_v40 = vld [vmem:[%s947_s29 + $0x8] sm:$0x7] }
  0x95   : > { %v701_v50 = vld [vmem:[%s947_s29 + $0xc] sm:$0x7]  ;;  %v703_v52 = vld [vmem:[%s947_s29 + $0x10] sm:$0x7] }
  0x96   : > { %v305_v9 = vrot.slane %v291_v4, %v297_v55  ;;  %766 = vmatmul.mubr.bf16.vlgmr.msra.gmra.mxu1 %v414_v5 }
  0x98   : > { %v306_v10 = vcombine.low %v298_v6, %v305_v9 }
  0x9a   : > { %746 = vmatmul.mubr.bf16.vlgmr.msra.gmra.mxu0 %v306_v10 }
 0x156   : > { %v498_v8 = vpop.f32.mrf.mxu1 }
 0x158   : > { %v767_v11 = vpop.f32.mrf.mxu1 }
 0x15a   : > { %v390_v12 = vpop.f32.mrf.mxu0  ;;  %v501_v14 = vpop.f32.mrf.mxu1 }
 0x15b   : > { %v499_v15 = vadd.f32 %v498_v8, %v390_v12 }
 0x15c   : > { %v747_v16 = vpop.f32.mrf.mxu0  ;;  %v768_v17 = vpop.f32.mrf.mxu1 }
 0x15d   : > { %v512_v18 = vadd.f32 %v692_v13, %v499_v15 }
 0x15e   : > { %v393_v19 = vpop.f32.mrf.mxu0 }
 0x15f   : > { %v514_v20 = vmax.f32 %v512_v18, 0.0  ;;  %v502_v21 = vadd.f32 %v501_v14, %v393_v19 }
 0x160   : > { %v748_v22 = vpop.f32.mrf.mxu0 }
 0x161   : > { %v518_v23 = vcombine.high %v514_v20, %v514_v20  ;;  %v707_v24 = vpack.c.bf16 %v514_v20, %v514_v20  ;;  %v513_v25 = vadd.f32 %v692_v13, %v502_v21 }
 0x163   : > { %v708_v26 = vpack.c.bf16 %v518_v23, %v518_v23  ;;  %v546_v27 = vshrl.u32 %v707_v24, 16  ;;  %v515_v28 = vmax.f32 %v513_v25, 0.0  ;;  %v549_v30 = vshll.u32 %v707_v24, 16 }
 0x165   : > { %v548_v29 = vrot.slane %v546_v27, 7  ;;  %v553_v31 = vshrl.u32 %v708_v26, 16  ;;  %v519_v32 = vcombine.high %v515_v28, %v515_v28  ;;  %v709_v35 = vpack.c.bf16 %v515_v28, %v515_v28 }
 0x166   : > { %v556_v38 = vshll.u32 %v708_v26, 16 }
 0x167   : > { %v551_v36 = vor.u32 %v549_v30, %v548_v29  ;;  %v555_v37 = vrot.slane %v553_v31, 7  ;;  %v710_v39 = vpack.c.bf16 %v519_v32, %v519_v32  ;;  %v560_v41 = vshrl.u32 %v709_v35, 16 }
 0x168   : > { %v563_v46 = vshll.u32 %v709_v35, 16 }
 0x169   : > { %v558_v42 = vor.u32 %v556_v38, %v555_v37  ;;  %v582_v43 = vsel %vm965_vm4, %v551_v36, %v697_v34  ;;  %v567_v44 = vshrl.u32 %v710_v39, 16  ;;  %v562_v45 = vrot.slane %v560_v41, 7 }
 0x16a   : > { %698 = vst [vmem:[%s947_s29 + $0x4] sm:$0x7] %v582_v43  ;;  %v570_v49 = vshll.u32 %v710_v39, 16 }
 0x16b   : > { %v585_v47 = vsel %vm965_vm4, %v558_v42, %v699_v40  ;;  %v569_v48 = vrot.slane %v567_v44, 7  ;;  %v565_v51 = vor.u32 %v563_v46, %v562_v45 }
 0x16c   : > { %700 = vst [vmem:[%s947_s29 + $0x8] sm:$0x7] %v585_v47 }
 0x16d   : > { %v572_v53 = vor.u32 %v570_v49, %v569_v48  ;;  %v588_v54 = vsel %vm965_vm4, %v565_v51, %v701_v50 }
 0x16e   : > { %702 = vst [vmem:[%s947_s29 + $0xc] sm:$0x7] %v588_v54 }
 0x16f   : > { %v591_v55 = vsel %vm965_vm4, %v572_v53, %v703_v52 }
 0x170   : > { %704 = vst [vmem:[%s947_s29 + $0x10] sm:$0x7] %v591_v55 }
 0x171 PF: > { %s13_s12 = sadd.s32 1, %s811_s12  }
 0x172   : > { %p10_p4 = scmp.ge.s32.totalorder %s13_s12, 4  }
 0x174   :  { %12 = sbr.rel (!%p10_p4) target bundleno = 1 (0x1), region = 64 }

// kernel: _encoder_forward.7
= control target key start
LH: loop header
LB: loop body
LE: loop exit
PB: predicated region body
PF: predicated region fallthrough
CT: control target
= control target key end

     0   :  { %s990_s12 = smov 0   ;;  %s1192_s0 = inlined_call_operand.vmem [shape: bf16[2,6,6,32], index: 0, kind: input, shape index: {}]   ;;  %s1193_s1 = inlined_call_operand.vmem [shape: bf16[3,96,32], index: 1, kind: input, shape index: {}]   ;;  %s1194_s2 = inlined_call_operand.vmem [shape: f32[1,32], index: 2, kind: input, shape index: {}]   ;;  %s1195_s3 = inlined_call_operand.vmem [shape: bf16[2,6,6,32], index: 3, kind: output, shape index: {}]  }
   0x1 LB: > { %s771_s13 = sadd.s32 4294967295, %s962_s12   ;;  %p775_p0 = scmp.ge.s32.totalorder %s962_s12, 1  ;;  %s962_s12 = sphi %s990_s12, %s13_s12  }
   0x2   : > { %p137_p1 = scmp.lt.s32.totalorder %s962_s12, 3 }
   0x4   : > { %p138_p2 = pnand %p775_p0, %p137_p1 }
   0x5   : > { %p161_p3 = scmp.lt.s32.totalorder (!%p138_p2), %s771_s13, 1  ;;  %s965_s5 = smov (!%p138_p2), 64  }
   0x6   : > { %141 = sbr.rel (%p138_p2) target bundleno = 392 (0x188), region = 32  ;;  %s966_s10 = smov (!%p138_p2), 32  }
   0xb   : > { %v938_v0 = vld [vmem:[%s1193_s1 + $0x58] sm:$0xff]   ;;  %v964_v1 = vmov 0.0   ;;  %v939_v2 = vld [vmem:[%s1193_s1 + $0x50] sm:$0xff]   ;;  %s1199_s13 = smov (!%p161_p3, %s771_s13), 1  ;;  %v940_v3 = vld [vmem:[%s1193_s1 + $0x28] sm:$0xff]   ;;  %vm967_vm0 = vmmov 0   ;;  %v314_v61 = vlaneseq }
   0xc   : > { %869 = vmatprep.subr.bf16.mxu0 %v964_v1  ;;  %885 = vmatprep.subr.bf16.mxu1 %v964_v1  ;;  %s917_s20 = smul.u32 24, %s1199_s13  ;;  %v942_v4 = vld [vmem:[%s1193_s1 + $0x20] sm:$0xff]   ;;  %v941_v5 = vld [vmem:[%s1193_s1 + $0x48] sm:$0xff]   ;;  %v944_v16 = vld [vmem:[%s1193_s1 + $0x18] sm:$0xff]   ;;  %v968_v59 = vmov 1983009808  }
   0xd   : > { %870 = vmatpush3.bf16.msra.mxu0 %v938_v0  ;;  %886 = vmatpush3.bf16.msra.mxu1 %v940_v3  ;;  %v943_v14 = vld [vmem:[%s1193_s1 + $0x40] sm:$0xff]   ;;  %v946_v32 = vld [vmem:[%s1193_s1 + $0x10] sm:$0xff]   ;;  %v945_v36 = vld [vmem:[%s1193_s1 + $0x38] sm:$0xff]   ;;  %v312_v60 = vunpack.c.l.s4 %v968_v59  ;;  %vm238_vm1 = vcmask 261120   ;;  %vm251_vm2 = vcmask 523264   ;;  %v315_v3 = vshrl.u32 %v314_v61, 7 }
   0xe   : > { %871 = vmatprep.subr.bf16.mxu0 %v964_v1  ;;  %887 = vmatprep.subr.bf16.mxu1 %v964_v1  ;;  %s165_s25 = scalar_lea.vmem %s1192_s0, %s917_s20  ;;  %v948_v44 = vld [vmem:[%s1193_s1 + $0x8] sm:$0xff]   ;;  %v947_v46 = vld [vmem:[%s1193_s1 + $0x30] sm:$0xff]   ;;  %v950_v48 = vld [vmem:[%s1193_s1] sm:$0xff]   ;;  %vm362_vm3 = vcmask 785408   ;;  %s1151_s7 = scalar_lea.vmem %s1195_s3, %s917_s20  ;;  %vm645_vm4 = vcmask 256000  }
   0xf   : > { %v1025_v6 = vld [vmem:[%s165_s25 + $0x8] sm:$0x7]  ;;  %v1027_v7 = vld [vmem:[%s165_s25 + $0x4] sm:$0x7]  ;;  %v1029_v8 = vld [vmem:[%s165_s25 + $0xc] sm:$0x7]  ;;  %881 = vmatprep.mubr.msk.bf16.mxu0 %vm967_vm0, %v964_v1  ;;  %897 = vmatprep.mubr.msk.bf16.mxu1 %vm967_vm0, %v964_v1 }
  0x10   : > { %v780_v9 = vcombine.low %v1025_v6, %v1025_v6  ;;  %v779_v10 = vcombine.low %v1027_v7, %v1027_v7  ;;  %v1038_v11 = vcombine.low %v1029_v8, %v1029_v8  ;;  %v1040_v12 = vld [vmem:[%s165_s25 + $0x10] sm:$0x7]  ;;  %v1042_v13 = vld [vmem:[%s165_s25] sm:$0x7]  ;;  %v1055_v21 = vld [vmem:[%s165_s25 + $0x14] sm:$0x7] }
  0x11   : > { %872 = vmatpush3.bf16.msra.mxu0 %v939_v2  ;;  %888 = vmatpush3.bf16.msra.mxu1 %v942_v4  ;;  %v782_v15 = vcombine.low %v1040_v12, %v1040_v12  ;;  %v778_v28 = vcombine.low %v1042_v13, %v1042_v13  ;;  %v809_v35 = vcombine.low %v1055_v21, %v1055_v21  ;;  %v313_v2 = vunpack.c.0.s8 %v312_v60 }
  0x12   : > { %873 = vmatprep.subr.bf16.mxu0 %v964_v1  ;;  %889 = vmatprep.subr.bf16.mxu1 %v964_v1  ;;  %v228_v17 = vrot.slane %v780_v9, 1  ;;  %v227_v18 = vrot.slane %v779_v10, 1  ;;  %v212_v19 = vshrl.u32 %v1038_v11, 16  ;;  %v214_v20 = vshll.u32 %v1038_v11, 16 }
  0x13   : > { %v198_v22 = vshrl.u32 %v779_v10, 16  ;;  %v200_v23 = vshll.u32 %v779_v10, 16  ;;  %v278_v24 = vshll.u32 %v782_v15, 16  ;;  %v276_v26 = vshrl.u32 %v782_v15, 16 }
  0x14   : > { %234 = vrot.lane.b32.xlu1 %v228_v17, %s965_s5  ;;  %232 = vrot.lane.b32.xlu0 %v227_v18, %s965_s5  ;;  %v216_v25 = vrot.slane %v214_v20, 1  ;;  %v207_v27 = vshll.u32 %v780_v9, 16  ;;  %v205_v31 = vshrl.u32 %v780_v9, 16  ;;  %v284_v39 = vrot.slane %v782_v15, 1 }
  0x15   : > { %874 = vmatpush3.bf16.msra.mxu0 %v941_v5  ;;  %v202_v29 = vrot.slane %v200_v23, 1  ;;  %v280_v30 = vrot.slane %v278_v24, 1  ;;  %890 = vmatpush3.bf16.msra.mxu1 %v944_v16  ;;  %v193_v40 = vshll.u32 %v778_v28, 16  ;;  %v229_v42 = vrot.slane %v1038_v11, 1 }
  0x16   : > { %875 = vmatprep.subr.bf16.mxu0 %v964_v1  ;;  %v217_v33 = vor.u32 %v216_v25, %v212_v19  ;;  %v209_v34 = vrot.slane %v207_v27, 1  ;;  %891 = vmatprep.subr.bf16.mxu1 %v964_v1  ;;  %v191_v43 = vshrl.u32 %v778_v28, 16  ;;  %v511_v45 = vshll.u32 %v809_v35, 16 }
  0x17   : > { %v203_v37 = vor.u32 %v202_v29, %v198_v22  ;;  %v281_v38 = vor.u32 %v280_v30, %v276_v26  ;;  %v195_v47 = vrot.slane %v193_v40, 1  ;;  %v226_v49 = vrot.slane %v778_v28, 1  ;;  %v951_v30 = vld [vmem:[%s1193_s1 + $0x80] sm:$0xff]  }
  0x18   : > { %224 = vrot.lane.b32.xlu1 %v217_v33, %s966_s10  ;;  %v210_v41 = vor.u32 %v209_v34, %v205_v31  ;;  %v509_v51 = vshrl.u32 %v809_v35, 16  ;;  %v513_v52 = vrot.slane %v511_v45, 1  ;;  %v517_v53 = vrot.slane %v809_v35, 1  ;;  %v953_v35 = vld [vmem:[%s1193_s1 + $0x70] sm:$0xff]  }
  0x19   : > { %876 = vmatpush3.bf16.msra.mxu0 %v943_v14  ;;  %220 = vrot.lane.b32.xlu0 %v203_v37, %s966_s10  ;;  %v196_v50 = vor.u32 %v195_v47, %v191_v43  ;;  %v316_v15 = vsub.s32 %v313_v2, %v315_v3  ;;  %v954_v37 = vld [vmem:[%s1193_s1 + $0x68] sm:$0xff]   ;;  %vm702_vm5 = vsmask.f32 2306 }
  0x1a   : > { %877 = vmatprep.subr.bf16.mxu0 %v964_v1  ;;  %892 = vmatpush3.bf16.msra.mxu1 %v946_v32  ;;  %v514_v54 = vor.u32 %v513_v52, %v509_v51  ;;  %v952_v32 = vld [vmem:[%s1193_s1 + $0x78] sm:$0xff]   ;;  %v829_v51 = vld [vmem:[%s1194_s2] ss:$0 sm:$0xff]  ;;  %vm1169_vm6 = vmand %vm645_vm4, %vm702_vm5 }
  0x1b   : > { %893 = vmatprep.subr.bf16.mxu1 %v964_v1 }
  0x1c   : > { %282 = vrot.lane.b32.xlu1 %v281_v38, %s966_s10 }
  0x1d   : > { %878 = vmatpush3.bf16.msra.mxu0 %v945_v36  ;;  %222 = vrot.lane.b32.xlu0 %v210_v41, %s966_s10  ;;  %v969_v41 = vmov 0  }
  0x1e   : > { %879 = vmatprep.subr.bf16.mxu0 %v964_v1  ;;  %894 = vmatpush3.bf16.msra.mxu1 %v948_v44  ;;  %646 = vst.msk [vmem:[%s1151_s7] sm:$0x7] %vm645_vm4, %v969_v41  ;;  %647 = vst.msk [vmem:[%s1151_s7 + $0x4] sm:$0x7] %vm645_vm4, %v969_v41 }
  0x1f   : > { %895 = vmatprep.subr.bf16.mxu1 %v964_v1  ;;  %648 = vst.msk [vmem:[%s1151_s7 + $0x8] sm:$0x7] %vm645_vm4, %v969_v41  ;;  %651 = vst.msk [vmem:[%s1151_s7 + $0x14] sm:$0x7] %vm645_vm4, %v969_v41 }
  0x20   : > { %285 = vrot.lane.b32.xlu1 %v284_v39, %s965_s5  ;;  %649 = vst.msk [vmem:[%s1151_s7 + $0xc] sm:$0x7] %vm645_vm4, %v969_v41  ;;  %650 = vst.msk [vmem:[%s1151_s7 + $0x10] sm:$0x7] %vm645_vm4, %v969_v41 }
  0x21   : > { %880 = vmatpush3.bf16.msra.mxu0 %v947_v46  ;;  %236 = vrot.lane.b32.xlu0 %v229_v42, %s965_s5 }
  0x22   : > { %901 = vmatprep.subr.bf16.mxu0 %v964_v1  ;;  %896 = vmatpush3.bf16.msra.mxu1 %v950_v48 }
  0x24   : > { %230 = vrot.lane.b32.xlu1 %v226_v49, %s965_s5 }
  0x25   : > { %218 = vrot.lane.b32.xlu0 %v196_v50, %s966_s10 }
  0x28   : > { %518 = vrot.lane.b32.xlu1 %v517_v53, %s965_s5 }
  0x29   : > { %515 = vrot.lane.b32.xlu0 %v514_v54, %s966_s10 }
  0x86   : > { %v235_v55 = vpop.permute.xlu1 %234  ;;  %v233_v56 = vpop.permute.xlu0 %232 }
  0x8a   : > { %v225_v57 = vpop.permute.xlu1 %224 }
  0x8b   : > { %v221_v58 = vpop.permute.xlu0 %220  ;;  %v250_v14 = vsel %vm238_vm1, %v1029_v8, %v225_v57  ;;  %v949_v8 = vld [vmem:[%s1193_s1 + $0x88] sm:$0xff]  }
  0x8c   : > { %v244_v63 = vsel %vm238_vm1, %v1027_v7, %v221_v58 }
  0x8d   : > { %v255_v11 = vsel %vm251_vm2, %v244_v63, %v233_v56 }
  0x8e   : > { %v283_v62 = vpop.permute.xlu1 %282 }
  0x8f   : > { %v223_v0 = vpop.permute.xlu0 %222  ;;  %v289_v9 = vsel %vm238_vm1, %v1040_v12, %v283_v62 }
  0x90   : > { %v247_v4 = vsel %vm238_vm1, %v1025_v6, %v223_v0 }
  0x91   : > { %v257_v5 = vsel %vm251_vm2, %v247_v4, %v235_v55 }
  0x92   : > { %v286_v10 = vpop.permute.xlu1 %285  ;;  %v309_v17 = vcombine.low %v255_v11, %v257_v5 }
  0x93   : > { %v291_v7 = vsel %vm251_vm2, %v289_v9, %v286_v10  ;;  %v237_v16 = vpop.permute.xlu0 %236  ;;  %v834_v9 = vld [vmem:[%s1151_s7 + $0x4] sm:$0x7] }
  0x94   : > { %v259_v18 = vsel %vm251_vm2, %v250_v14, %v237_v16  ;;  %v317_v23 = vrot.slane %v309_v17, %v316_v15  ;;  %v836_v16 = vld [vmem:[%s1151_s7 + $0x8] sm:$0x7] }
  0x95   : > { %v310_v19 = vcombine.low %v259_v18, %v291_v7  ;;  %v409_v24 = vcombine.low %v257_v5, %v259_v18 }
  0x96   : > { %v231_v6 = vpop.permute.xlu1 %230 }
  0x97   : > { %v324_v20 = vrot.slane %v310_v19, %v316_v15  ;;  %v219_v22 = vpop.permute.xlu0 %218  ;;  %v423_v28 = vrot.slane %v409_v24, %v316_v15 }
  0x98   : > { %v241_v12 = vsel %vm238_vm1, %v1042_v13, %v219_v22 }
  0x99   : > { %v253_v25 = vsel %vm251_vm2, %v241_v12, %v231_v6  ;;  %v325_v26 = vcombine.low %v317_v23, %v324_v20 }
  0x9a   : > { %v408_v27 = vcombine.low %v253_v25, %v255_v11  ;;  %v519_v34 = vpop.permute.xlu1 %518 }
  0x9b   : > { %882 = vmatmul.mubr.msk.bf16.vlgmr.msra.gmra.mxu0 %vm362_vm3, %v325_v26  ;;  %v516_v31 = vpop.permute.xlu0 %515  ;;  %v840_v26 = vld [vmem:[%s1151_s7 + $0x10] sm:$0x7] }
  0x9c   : > { %v416_v29 = vrot.slane %v408_v27, %v316_v15  ;;  %902 = vmatpush3.bf16.msra.mxu0 %v949_v8  ;;  %913 = vmatprep.mubr.msk.bf16.mxu0 %vm967_vm0, %v964_v1  ;;  %v522_v33 = vsel %vm238_vm1, %v1055_v21, %v516_v31  ;;  %v955_v21 = vld [vmem:[%s1193_s1 + $0x60] sm:$0xff]   ;;  %v838_v8 = vld [vmem:[%s1151_s7 + $0xc] sm:$0x7] }
  0x9d   : > { %903 = vmatprep.subr.bf16.mxu0 %v964_v1  ;;  %v524_v36 = vsel %vm251_vm2, %v522_v33, %v519_v34 }
  0x9e   : > { %v424_v13 = vcombine.low %v416_v29, %v423_v28  ;;  %v539_v38 = vcombine.low %v291_v7, %v524_v36 }
  0xa0   : > { %904 = vmatpush3.bf16.msra.mxu0 %v951_v30  ;;  %898 = vmatmul.mubr.msk.bf16.vlgmr.msra.gmra.mxu1 %vm362_vm3, %v424_v13  ;;  %v546_v39 = vrot.slane %v539_v38, %v316_v15 }
  0xa1   : > { %905 = vmatprep.subr.bf16.mxu0 %v964_v1 }
  0xa2   : > { %v547_v40 = vcombine.low %v423_v28, %v546_v39 }
  0xa4   : > { %906 = vmatpush3.bf16.msra.mxu0 %v952_v32 }
  0xa5   : > { %907 = vmatprep.subr.bf16.mxu0 %v964_v1 }
  0xa8   : > { %908 = vmatpush3.bf16.msra.mxu0 %v953_v35 }
  0xa9   : > { %909 = vmatprep.subr.bf16.mxu0 %v964_v1 }
  0xac   : > { %910 = vmatpush3.bf16.msra.mxu0 %v954_v37 }
  0xad   : > { %911 = vmatprep.subr.bf16.mxu0 %v964_v1 }
  0xb0   : > { %912 = vmatpush3.bf16.msra.mxu0 %v955_v21 }
  0xb3   : > { %914 = vmatmul.mubr.msk.bf16.vlgmr.msra.gmra.mxu0 %vm362_vm3, %v547_v40 }
 0x15b   : > { %v400_v1 = vpop.f32.mrf.mxu0 }
 0x15d   : > { %v883_v42 = vpop.f32.mrf.mxu0 }
 0x15f   : > { %v403_v43 = vpop.f32.mrf.mxu0 }
 0x160   : > { %v498_v44 = vpop.f32.mrf.mxu1 }
 0x161   : > { %v884_v45 = vpop.f32.mrf.mxu0  ;;  %v499_v49 = vadd.f32 %v498_v44, %v400_v1 }
 0x162   : > { %v899_v46 = vpop.f32.mrf.mxu1 }
 0x164   : > { %v501_v47 = vpop.f32.mrf.mxu1 }
 0x165   : > { %v502_v54 = vadd.f32 %v501_v47, %v403_v43 }
 0x166   : > { %v900_v48 = vpop.f32.mrf.mxu1 }
 0x173   : > { %v621_v50 = vpop.f32.mrf.mxu0 }
 0x174   : > { %v628_v52 = vadd.f32 %v621_v50, %v499_v49 }
 0x175   : > { %v915_v53 = vpop.f32.mrf.mxu0 }
 0x176   : > { %v637_v55 = vadd.f32 %v829_v51, %v628_v52 }
 0x177   : > { %v624_v56 = vpop.f32.mrf.mxu0 }
 0x178   : > { %v641_v57 = vcombine.high %v637_v55, %v637_v55  ;;  %v844_v58 = vpack.c.bf16 %v637_v55, %v637_v55  ;;  %v629_v59 = vadd.f32 %v624_v56, %v502_v54 }
 0x179   : > { %v916_v60 = vpop.f32.mrf.mxu0 }
 0x17a   : > { %v845_v61 = vpack.c.bf16 %v641_v57, %v641_v57  ;;  %v669_v62 = vshrl.u32 %v844_v58, 16  ;;  %v638_v63 = vadd.f32 %v829_v51, %v629_v59  ;;  %v672_v2 = vshll.u32 %v844_v58, 16 }
 0x17c   : > { %v671_v0 = vrot.slane %v669_v62, 7  ;;  %v676_v3 = vshrl.u32 %v845_v61, 16  ;;  %v642_v4 = vcombine.high %v638_v63, %v638_v63  ;;  %v846_v10 = vpack.c.bf16 %v638_v63, %v638_v63 }
 0x17d   : > { %v679_v7 = vshll.u32 %v845_v61, 16 }
 0x17e   : > { %v674_v11 = vor.u32 %v672_v2, %v671_v0  ;;  %v678_v14 = vrot.slane %v676_v3, 7  ;;  %v847_v15 = vpack.c.bf16 %v642_v4, %v642_v4  ;;  %v683_v17 = vshrl.u32 %v846_v10, 16 }
 0x17f   : > { %v686_v22 = vshll.u32 %v846_v10, 16 }
 0x180   : > { %v681_v18 = vor.u32 %v679_v7, %v678_v14  ;;  %v705_v19 = vsel %vm1169_vm6, %v674_v11, %v834_v9  ;;  %v690_v6 = vshrl.u32 %v847_v15, 16  ;;  %v685_v20 = vrot.slane %v683_v17, 7 }
 0x181   : > { %835 = vst [vmem:[%s1151_s7 + $0x4] sm:$0x7] %v705_v19  ;;  %v693_v12 = vshll.u32 %v847_v15, 16 }
 0x182   : > { %v708_v23 = vsel %vm1169_vm6, %v681_v18, %v836_v16  ;;  %v692_v24 = vrot.slane %v690_v6, 7  ;;  %v688_v25 = vor.u32 %v686_v22, %v685_v20 }
 0x183   : > { %837 = vst [vmem:[%s1151_s7 + $0x8] sm:$0x7] %v708_v23 }
 0x184   : > { %v695_v27 = vor.u32 %v693_v12, %v692_v24  ;;  %v711_v28 = vsel %vm1169_vm6, %v688_v25, %v838_v8 }
 0x185   : > { %839 = vst [vmem:[%s1151_s7 + $0xc] sm:$0x7] %v711_v28 }
 0x186   : > { %v714_v29 = vsel %vm1169_vm6, %v695_v27, %v840_v26 }
 0x187   : > { %841 = vst [vmem:[%s1151_s7 + $0x10] sm:$0x7] %v714_v29 }
 0x188 PF: > { %s13_s12 = sadd.s32 1, %s962_s12  }
 0x189   : > { %p10_p4 = scmp.ge.s32.totalorder %s13_s12, 4  }
 0x18b   :  { %12 = sbr.rel (!%p10_p4) target bundleno = 1 (0x1), region = 65 }

// kernel: _encoder_forward.9
= control target key start
LH: loop header
LB: loop body
LE: loop exit
PB: predicated region body
PF: predicated region fallthrough
CT: control target
= control target key end

     0   :  { %8 = vsyncpa [#allocation3], 0  ;;  %s1362_s0 = inlined_call_operand.vmem [shape: bf16[2,6,6,32], index: 0, kind: input, shape index: {}]   ;;  %s1363_s1 = inlined_call_operand.vmem [shape: bf16[3,96,8], index: 1, kind: input, shape index: {}]   ;;  %s1364_s2 = inlined_call_operand.vmem [shape: bf16[8,32], index: 2, kind: input, shape index: {}]   ;;  %s1365_s3 = inlined_call_operand.hbm [shape: f32[2,4,4,32], index: 3, kind: output, shape index: {}]  }
   0x1   :  { %10 = vsyncpa [#allocation3 + $0x1], 0  ;;  %s1088_s12 = smov 0   ;;  %s1090_s13 = smov 0  }
   0x2   :  { %s1092_s14 = smov 0   ;;  %s1094_s15 = smov 0  }
   0x3 LB: > { %s1109_s16 = sadd.s32 4294967295, %s1058_s15   ;;  %s792_s17 = sadd.s32 4294967294, %s1058_s15   ;;  %s1058_s15 = sphi %s1094_s15, %s1371_s15   ;;  %s1054_s14 = sphi %s1092_s14, %s1370_s14   ;;  %s1050_s13 = sphi %s1090_s13, %s1369_s13   ;;  %s1046_s12 = sphi %s1088_s12, %s1368_s12  }
   0x4   : > { %s1113_s18 = sadd.s32 1, %s1058_s15   ;;  %s91_s19 = sadd.s32 1, %s1054_s14 }
   0x5   : > { %s88_s20 = ssub.s32 %s1058_s15, %s1113_s18  ;;  %p101_p0 = scmp.ne.s32.totalorder %s1054_s14, %s1050_s13 }
   0x6   : > { %p89_p1 = scmp.eq.s32.totalorder %s88_s20, 0  ;;  %p102_p2 = scmp.eq.s32.totalorder %s1109_s16, 1 }
   0x7   : > { %p107_p3 = scmp.ne.s32.totalorder %s1050_s13, %s1046_s12  ;;  %p108_p4 = scmp.eq.s32.totalorder %s792_s17, 1 }
   0x8   : > { %s1124_s21 = scalar_select %p89_p1, %s1054_s14, %s91_s19  }
   0x9   : > { %p1126_p5 = por %p102_p2, %p101_p0  ;;  %p1130_p6 = por %p108_p4, %p107_p3 }
   0xa   : > { %p795_p7 = scmp.ge.s32.totalorder %s1058_s15, 1  ;;  %p140_p8 = scmp.lt.s32.totalorder %s1058_s15, 3 }
   0xc   : > { %p141_p9 = pnand %p795_p7, %p140_p8 }
   0xd   : > { %p164_p10 = scmp.lt.s32.totalorder (!%p141_p9), %s1109_s16, 1  ;;  %s1062_s27 = smov (!%p141_p9), 64  }
   0xe   : > { %144 = sbr.rel (%p141_p9) target bundleno = 612 (0x264), region = 32  ;;  %s1063_s5 = smov (!%p141_p9), 32  }
   0xf   : > { %s161_s7 = sand.u32 (!%p141_p9), 1, %s1050_s13   ;;  %s855_s10 = sshll.u32 (!%p141_p9), %s1109_s16, 8 }
  0x10   : > { %s796_s8 = sshll.u32 (!%p141_p9), %s161_s7, 4  ;;  %s1312_s20 = scalar_lea.hbm (!%p141_p9), %s1365_s3, %s855_s10 }
  0x11   : > { %s1066_s25 = smov (!%p141_p9), [#allocation2]  }
  0x13   : > { %v1060_v0 = vmov 0.0   ;;  %v980_v1 = vld [vmem:[%s1363_s1 + $0x58] sm:$0xff]   ;;  %s165_s26 = scalar_select %p164_p10, %s1109_s16, 1  ;;  %v981_v2 = vld [vmem:[%s1363_s1 + $0x50] sm:$0xff]   ;;  %v982_v3 = vld [vmem:[%s1363_s1 + $0x28] sm:$0xff]   ;;  %v1061_v9 = vmov 0  }
  0x14   : > { %879 = vmatprep.subr.bf16.mxu0 %v1060_v0  ;;  %895 = vmatprep.subr.bf16.mxu1 %v1060_v0  ;;  %v984_v4 = vld [vmem:[%s1363_s1 + $0x20] sm:$0xff]   ;;  %v983_v5 = vld [vmem:[%s1363_s1 + $0x48] sm:$0xff]   ;;  %v986_v17 = vld [vmem:[%s1363_s1 + $0x18] sm:$0xff]   ;;  %vm1064_vm0 = vmmov 0   ;;  %vm242_vm1 = vcmask 261120   ;;  %vm255_vm2 = vcmask 523264  }
  0x15   : > { %880 = vmatpush3.bf16.msra.mxu0 %v980_v1  ;;  %s933_s4 = smul.u32 24, %s165_s26  ;;  %896 = vmatpush3.bf16.msra.mxu1 %v982_v3  ;;  %v985_v22 = vld [vmem:[%s1363_s1 + $0x40] sm:$0xff]   ;;  %v988_v32 = vld [vmem:[%s1363_s1 + $0x10] sm:$0xff]   ;;  %v987_v40 = vld [vmem:[%s1363_s1 + $0x38] sm:$0xff]   ;;  %v1065_v3 = vmov 1983009808  }
  0x16   : > { %881 = vmatprep.subr.bf16.mxu0 %v1060_v0  ;;  %897 = vmatprep.subr.bf16.mxu1 %v1060_v0  ;;  %v990_v45 = vld [vmem:[%s1363_s1 + $0x8] sm:$0xff]   ;;  %v989_v51 = vld [vmem:[%s1363_s1 + $0x30] sm:$0xff]   ;;  %v992_v55 = vld [vmem:[%s1363_s1] sm:$0xff]   ;;  %vm366_vm3 = vcmask 785408   ;;  %vm642_vm4 = vcmask 1043456   ;;  %vm638_vm5 = vcmask 64512  }
  0x17   : > { %s168_s9 = scalar_lea.vmem %s1362_s0, %s933_s4  ;;  %891 = vmatprep.mubr.msk.bf16.mxu0 %vm1064_vm0, %v1060_v0  ;;  %907 = vmatprep.mubr.msk.bf16.mxu1 %vm1064_vm0, %v1060_v0  ;;  %vm711_vm6 = vcmask 258049   ;;  %s1320_s16 = scalar_lea.sflag [#allocation3], %s161_s7 }
  0x18   : > { %v1160_v6 = vld [vmem:[%s168_s9 + $0x8] sm:$0x7]  ;;  %v1162_v7 = vld [vmem:[%s168_s9 + $0x4] sm:$0x7]  ;;  %v1164_v8 = vld [vmem:[%s168_s9 + $0xc] sm:$0x7] }
  0x19   : > { %882 = vmatpush3.bf16.msra.mxu0 %v981_v2  ;;  %v1167_v10 = vmax.bf16 %v1061_v9, %v1160_v6  ;;  %v1170_v11 = vmax.bf16 %v1061_v9, %v1162_v7  ;;  %v1173_v12 = vmax.bf16 %v1061_v9, %v1164_v8  ;;  %v1175_v13 = vld [vmem:[%s168_s9 + $0x10] sm:$0x7]  ;;  %v170_v14 = vld [vmem:[%s168_s9] sm:$0x7]  ;;  %v175_v15 = vld [vmem:[%s168_s9 + $0x14] sm:$0x7]  ;;  %898 = vmatpush3.bf16.msra.mxu1 %v984_v4  ;;  %v316_v4 = vunpack.c.l.s4 %v1065_v3 }
  0x1a   : > { %883 = vmatprep.subr.bf16.mxu0 %v1060_v0  ;;  %v1179_v16 = vmax.bf16 %v1061_v9, %v1175_v13  ;;  %v1192_v21 = vmax.bf16 %v1061_v9, %v170_v14  ;;  %899 = vmatprep.subr.bf16.mxu1 %v1060_v0  ;;  %v1200_v24 = vmax.bf16 %v1061_v9, %v175_v15  ;;  %s163_s9 = scalar_lea.vmem [#allocation2], %s796_s8  ;;  %s1002_s26 = sshll.u32 %s1066_s25, 4  ;;  %s1003_s26 = int_to_ptr.vmem [resolvable:$false] %s1002_s26 }
  0x1b   : > { %v800_v18 = vcombine.low %v1167_v10, %v1167_v10  ;;  %v799_v19 = vcombine.low %v1170_v11, %v1170_v11  ;;  %v1190_v20 = vcombine.low %v1173_v12, %v1173_v12  ;;  %s730_s11 = sshll.u32 %s163_s9, 4  ;;  %s1004_s28 = scalar_lea.vmem %s1003_s26, 512  ;;  %s1315_s11 = int_to_ptr.vmem [resolvable:$true] %s730_s11 }
  0x1c   : > { %v802_v23 = vcombine.low %v1179_v16, %v1179_v16  ;;  %v798_v36 = vcombine.low %v1192_v21, %v1192_v21  ;;  %v829_v43 = vcombine.low %v1200_v24, %v1200_v24  ;;  %s998_s24 = scalar_lea.vmem %s1315_s11, 256  ;;  %p1005_p0 = scmp.lt.s32.totalorder %s1315_s11, %s1003_s26 }
  0x1d   : > { %884 = vmatpush3.bf16.msra.mxu0 %v983_v5  ;;  %v232_v25 = vrot.slane %v800_v18, 1  ;;  %v231_v26 = vrot.slane %v799_v19, 1  ;;  %v216_v27 = vshrl.u32 %v1190_v20, 16  ;;  %v218_v28 = vshll.u32 %v1190_v20, 16  ;;  %900 = vmatpush3.bf16.msra.mxu1 %v986_v17  ;;  %p999_p11 = scmp.ne.s32.totalorder %s1315_s11, %s998_s24  ;;  %p1006_p1 = scmp.lt.s32.totalorder %s1004_s28, %s998_s24 }
  0x1e   : > { %885 = vmatprep.subr.bf16.mxu0 %v1060_v0  ;;  %v202_v29 = vshrl.u32 %v799_v19, 16  ;;  %v204_v30 = vshll.u32 %v799_v19, 16  ;;  %v282_v31 = vshll.u32 %v802_v23, 16  ;;  %v280_v34 = vshrl.u32 %v802_v23, 16  ;;  %901 = vmatprep.subr.bf16.mxu1 %v1060_v0 }
  0x1f   : > { %238 = vrot.lane.b32.xlu1 %v232_v25, %s1062_s27  ;;  %236 = vrot.lane.b32.xlu0 %v231_v26, %s1062_s27  ;;  %v220_v33 = vrot.slane %v218_v28, 1  ;;  %v211_v35 = vshll.u32 %v800_v18, 16  ;;  %v209_v39 = vshrl.u32 %v800_v18, 16  ;;  %v197_v47 = vshll.u32 %v798_v36, 16  ;;  %p1000_p12 = pnand %p999_p11, %p1126_p5  ;;  %p1007_p2 = por %p1006_p1, %p1005_p0 }
  0x20   : > { %v206_v37 = vrot.slane %v204_v30, 1  ;;  %v284_v38 = vrot.slane %v282_v31, 1  ;;  %v288_v49 = vrot.slane %v802_v23, 1  ;;  %v233_v50 = vrot.slane %v1190_v20, 1 }
  0x21   : > { %886 = vmatpush3.bf16.msra.mxu0 %v985_v22  ;;  %v221_v41 = vor.u32 %v220_v33, %v216_v27  ;;  %v213_v42 = vrot.slane %v211_v35, 1  ;;  %902 = vmatpush3.bf16.msra.mxu1 %v988_v32  ;;  %v195_v52 = vshrl.u32 %v798_v36, 16  ;;  %v515_v53 = vshll.u32 %v829_v43, 16  ;;  %p1001_p13 = pneg %p1000_p12 }
  0x22   : > { %887 = vmatprep.subr.bf16.mxu0 %v1060_v0  ;;  %v207_v44 = vor.u32 %v206_v37, %v202_v29  ;;  %v285_v46 = vor.u32 %v284_v38, %v280_v34  ;;  %903 = vmatprep.subr.bf16.mxu1 %v1060_v0  ;;  %v199_v54 = vrot.slane %v197_v47, 1  ;;  %v230_v56 = vrot.slane %v798_v36, 1 }
  0x23   : > { %228 = vrot.lane.b32.xlu1 %v221_v41, %s1063_s5  ;;  %v214_v48 = vor.u32 %v213_v42, %v209_v39  ;;  %v513_v58 = vshrl.u32 %v829_v43, 16  ;;  %v517_v59 = vrot.slane %v515_v53, 1  ;;  %v521_v60 = vrot.slane %v829_v43, 1  ;;  %v993_v41 = vld [vmem:[%s1363_s1 + $0x80] sm:$0xff]   ;;  %v994_v43 = vld [vmem:[%s1363_s1 + $0x78] sm:$0xff]   ;;  %p1008_p3 = pnand %p1007_p2, %p1001_p13 }
  0x24   : > { %224 = vrot.lane.b32.xlu0 %v207_v44, %s1063_s5  ;;  %v200_v57 = vor.u32 %v199_v54, %v195_v52  ;;  %v318_v5 = vlaneseq  ;;  %v317_v17 = vunpack.c.0.s8 %v316_v4  ;;  %v637_v52 = vld [vmem:[%s1364_s2] sm:$0xf] }
  0x25   : > { %888 = vmatpush3.bf16.msra.mxu0 %v987_v40  ;;  %904 = vmatpush3.bf16.msra.mxu1 %v990_v45  ;;  %v518_v61 = vor.u32 %v517_v59, %v513_v58  ;;  %v644_v53 = vsel %vm642_vm4, %v637_v52, 0 }
  0x26   : > { %889 = vmatprep.subr.bf16.mxu0 %v1060_v0  ;;  %905 = vmatprep.subr.bf16.mxu1 %v1060_v0  ;;  %v319_v18 = vshrl.u32 %v318_v5, 7 }
  0x27   : > { %286 = vrot.lane.b32.xlu1 %v285_v46, %s1063_s5  ;;  %v995_v46 = vld [vmem:[%s1363_s1 + $0x70] sm:$0xff]  }
  0x28   : > { %226 = vrot.lane.b32.xlu0 %v214_v48, %s1063_s5  ;;  %v320_v27 = vsub.s32 %v317_v17, %v319_v18  ;;  %v996_v48 = vld [vmem:[%s1363_s1 + $0x68] sm:$0xff]   ;;  %v691_v17 = vunpack.c.l.bf16 %v1162_v7 }
  0x29   : > { %890 = vmatpush3.bf16.msra.mxu0 %v989_v51  ;;  %906 = vmatpush3.bf16.msra.mxu1 %v992_v55 }
  0x2a   : > { %911 = vmatprep.subr.bf16.mxu0 %v1060_v0  ;;  %927 = vmatprep.subr.bf16.mxu1 %v1060_v0 }
  0x2b   : > { %289 = vrot.lane.b32.xlu1 %v288_v49, %s1062_s27 }
  0x2c   : > { %240 = vrot.lane.b32.xlu0 %v233_v50, %s1062_s27 }
  0x2f   : > { %234 = vrot.lane.b32.xlu1 %v230_v56, %s1062_s27 }
  0x30   : > { %222 = vrot.lane.b32.xlu0 %v200_v57, %s1063_s5 }
  0x33   : > { %522 = vrot.lane.b32.xlu1 %v521_v60, %s1062_s27 }
  0x34   : > { %519 = vrot.lane.b32.xlu0 %v518_v61, %s1063_s5 }
  0x91   : > { %v239_v62 = vpop.permute.xlu1 %238  ;;  %v237_v63 = vpop.permute.xlu0 %236 }
  0x95   : > { %v229_v1 = vpop.permute.xlu1 %228 }
  0x96   : > { %v225_v2 = vpop.permute.xlu0 %224  ;;  %v254_v26 = vsel %vm242_vm1, %v1173_v12, %v229_v1  ;;  %v991_v12 = vld [vmem:[%s1363_s1 + $0x88] sm:$0xff]  }
  0x97   : > { %v248_v14 = vsel %vm242_vm1, %v1170_v11, %v225_v2 }
  0x98   : > { %v259_v25 = vsel %vm255_vm2, %v248_v14, %v237_v63 }
  0x99   : > { %v287_v9 = vpop.permute.xlu1 %286 }
  0x9a   : > { %v227_v15 = vpop.permute.xlu0 %226  ;;  %v293_v22 = vsel %vm242_vm1, %v1179_v16, %v287_v9 }
  0x9b   : > { %v251_v19 = vsel %vm242_vm1, %v1167_v10, %v227_v15 }
  0x9c   : > { %v261_v20 = vsel %vm255_vm2, %v251_v19, %v239_v62 }
  0x9d   : > { %v290_v23 = vpop.permute.xlu1 %289  ;;  %v313_v29 = vcombine.low %v259_v25, %v261_v20 }
  0x9e   : > { %v295_v11 = vsel %vm255_vm2, %v293_v22, %v290_v23  ;;  %v241_v28 = vpop.permute.xlu0 %240 }
  0x9f   : > { %v263_v30 = vsel %vm255_vm2, %v254_v26, %v241_v28  ;;  %v321_v34 = vrot.slane %v313_v29, %v320_v27  ;;  %v694_v28 = vunpack.c.l.bf16 %v1175_v13 }
  0xa0   : > { %v314_v31 = vcombine.low %v263_v30, %v295_v11  ;;  %v413_v35 = vcombine.low %v261_v20, %v263_v30  ;;  %v692_v20 = vunpack.c.l.bf16 %v1160_v6 }
  0xa1   : > { %v235_v10 = vpop.permute.xlu1 %234 }
  0xa2   : > { %v328_v32 = vrot.slane %v314_v31, %v320_v27  ;;  %v223_v33 = vpop.permute.xlu0 %222  ;;  %v427_v39 = vrot.slane %v413_v35, %v320_v27 }
  0xa3   : > { %v245_v16 = vsel %vm242_vm1, %v1192_v21, %v223_v33 }
  0xa4   : > { %v257_v36 = vsel %vm255_vm2, %v245_v16, %v235_v10  ;;  %v329_v37 = vcombine.low %v321_v34, %v328_v32 }
  0xa5   : > { %v412_v38 = vcombine.low %v257_v36, %v259_v25  ;;  %v523_v45 = vpop.permute.xlu1 %522 }
  0xa6   : > { %892 = vmatmul.mubr.msk.bf16.vlgmr.msra.gmra.mxu0 %vm366_vm3, %v329_v37  ;;  %v520_v42 = vpop.permute.xlu0 %519 }
  0xa7   : > { %v420_v40 = vrot.slane %v412_v38, %v320_v27  ;;  %912 = vmatpush3.bf16.msra.mxu0 %v991_v12  ;;  %923 = vmatprep.mubr.msk.bf16.mxu0 %vm1064_vm0, %v1060_v0  ;;  %v526_v44 = vsel %vm242_vm1, %v1200_v24, %v520_v42  ;;  %v997_v24 = vld [vmem:[%s1363_s1 + $0x60] sm:$0xff]  }
  0xa8   : > { %913 = vmatprep.subr.bf16.mxu0 %v1060_v0  ;;  %v528_v47 = vsel %vm255_vm2, %v526_v44, %v523_v45 }
  0xa9   : > { %v428_v21 = vcombine.low %v420_v40, %v427_v39  ;;  %v543_v49 = vcombine.low %v295_v11, %v528_v47  ;;  %v693_v11 = vunpack.c.l.bf16 %v1164_v8 }
  0xab   : > { %914 = vmatpush3.bf16.msra.mxu0 %v993_v41  ;;  %908 = vmatmul.mubr.msk.bf16.vlgmr.msra.gmra.mxu1 %vm366_vm3, %v428_v21  ;;  %v550_v50 = vrot.slane %v543_v49, %v320_v27 }
  0xac   : > { %915 = vmatprep.subr.bf16.mxu0 %v1060_v0  ;;  %929 = vmatprep.mubr.msk.bf16.mxu1 %vm1064_vm0, %v1060_v0 }
  0xad   : > { %v551_v51 = vcombine.low %v427_v39, %v550_v50  ;;  %928 = vmatpush3.bf16.msra.mxu1 %v644_v53 }
  0xaf   : > { %916 = vmatpush3.bf16.msra.mxu0 %v994_v43 }
  0xb0   : > { %917 = vmatprep.subr.bf16.mxu0 %v1060_v0 }
  0xb3   : > { %918 = vmatpush3.bf16.msra.mxu0 %v995_v46 }
  0xb4   : > { %919 = vmatprep.subr.bf16.mxu0 %v1060_v0 }
  0xb7   : > { %920 = vmatpush3.bf16.msra.mxu0 %v996_v48 }
  0xb8   : > { %921 = vmatprep.subr.bf16.mxu0 %v1060_v0 }
  0xbb   : > { %922 = vmatpush3.bf16.msra.mxu0 %v997_v24 }
  0xbe   : > { %924 = vmatmul.mubr.msk.bf16.vlgmr.msra.gmra.mxu0 %vm366_vm3, %v551_v51 }
 0x166   : > { %v404_v54 = vpop.f32.mrf.mxu0 }
 0x168   : > { %v893_v55 = vpop.f32.mrf.mxu0 }
 0x16a   : > { %v407_v56 = vpop.f32.mrf.mxu0 }
 0x16b   : > { %v502_v57 = vpop.f32.mrf.mxu1 }
 0x16c   : > { %v894_v58 = vpop.f32.mrf.mxu0  ;;  %v503_v62 = vadd.f32 %v502_v57, %v404_v54 }
 0x16d   : > { %v909_v59 = vpop.f32.mrf.mxu1 }
 0x16f   : > { %v505_v60 = vpop.f32.mrf.mxu1 }
 0x170   : > { %v506_v1 = vadd.f32 %v505_v60, %v407_v56 }
 0x171   : > { %v910_v0 = vpop.f32.mrf.mxu1 }
 0x17e   : > { %v625_v61 = vpop.f32.mrf.mxu0 }
 0x17f   : > { %v632_v2 = vadd.f32 %v625_v61, %v503_v62 }
 0x180   : > { %v925_v63 = vpop.f32.mrf.mxu0 }
 0x181   : > { %v634_v9 = vmax.f32 %v632_v2, 0.0 }
 0x182   : > { %v628_v3 = vpop.f32.mrf.mxu0 }
 0x183   : > { %v633_v4 = vadd.f32 %v628_v3, %v506_v1 }
 0x184   : > { %v926_v5 = vpop.f32.mrf.mxu0 }
 0x185   : > { %v635_v14 = vmax.f32 %v633_v4, 0.0 }
 0x187   : > { %v636_v15 = vpack.c.bf16 %v635_v14, %v634_v9 }
 0x189   : > { %930 = vmatmul.mubr.msk.bf16.vlgmr.msra.gmra.mxu1 %vm638_vm5, %v636_v15 }
 0x249   : > { %v680_v18 = vpop.f32.mrf.mxu1 }
 0x24a   : > { %v689_v19 = vcombine.high %v680_v18, %v680_v18  ;;  %v695_v22 = vrot.slane %v680_v18, 7 }
 0x24b   : > { %v931_v23 = vpop.f32.mrf.mxu1 }
 0x24c   : > { %v696_v25 = vrot.slane %v689_v19, 7  ;;  %v703_v26 = vadd.f32 %v695_v22, %v691_v17 }
 0x24d   : > { %v683_v27 = vpop.f32.mrf.mxu1 }
 0x24e   : > { %v704_v29 = vadd.f32 %v696_v25, %v692_v20  ;;  %v707_v30 = vmax.f32 %v703_v26, 0.0  ;;  %v690_v7 = vcombine.high %v683_v27, %v683_v27  ;;  %v697_v31 = vrot.slane %v683_v27, 7 }
 0x24f   : > { %v932_v10 = vpop.f32.mrf.mxu1 }
 0x250   : > { %v708_v32 = vmax.f32 %v704_v29, 0.0  ;;  %712 = vst.msk [vmem:[%s163_s9 - $0x1] sm:$0x1e] %vm711_vm6, %v707_v30  ;;  %v698_v6 = vrot.slane %v690_v7, 7  ;;  %v705_v33 = vadd.f32 %v697_v31, %v693_v11 }
 0x252   : > { %713 = vst.msk [vmem:[%s163_s9 + $0x3] sm:$0x1e] %vm711_vm6, %v708_v32  ;;  %v706_v8 = vadd.f32 %v698_v6, %v694_v28  ;;  %v709_v34 = vmax.f32 %v705_v33, 0.0 }
 0x254   : > { %v710_v13 = vmax.f32 %v706_v8, 0.0  ;;  %714 = vst.msk [vmem:[%s163_s9 + $0x7] sm:$0x1e] %vm711_vm6, %v709_v34 }
 0x256   : > { %715 = vst.msk [vmem:[%s163_s9 + $0xb] sm:$0x1e] %vm711_vm6, %v710_v13 }
 0x257   : > { %1011 = shalt.err (!%p1008_p3)
}
 0x258   : > { %s1012_s29 = scalar_lea.hbm %s1312_s20, 256  ;;  %s1016_s5 = scalar_lea.hbm %s1365_s3, 512 }
 0x259   : > { %p1013_p4 = scmp.ne.s32.totalorder %s1312_s20, %s1012_s29  ;;  %p1017_p9 = scmp.lt.s32.totalorder %s1312_s20, %s1365_s3 }
 0x25a   : > { %p1018_p10 = scmp.lt.s32.totalorder %s1016_s5, %s1012_s29 }
 0x25b   : > { %p1014_p7 = pnand %p1013_p4, %p1126_p5 }
 0x25c   : > { %p1019_p11 = por %p1018_p10, %p1017_p9 }
 0x25d   : > { %p1015_p8 = pneg %p1014_p7 }
 0x25f   : > { %p1020_p12 = pnand %p1019_p11, %p1015_p8 }
 0x261   : > { %1023 = shalt.err (!%p1020_p12)
}
 0x262   : > { %s1067_s8 = smov 4  }
 0x263   : > { %934 = dma.vmem_to_hbm [thread:$0]  (%p1126_p5), %s1315_s11, 256, %s1312_s20, %s1320_s16, %s1062_s27, %s1062_s27, %s1067_s8  }
 0x264 PF: > { %p940_p13 = scmp.ge.s32.totalorder %s1058_s15, 2  ;;  %s745_s9 = sand.u32 1, %s1046_s12  }
 0x265   : > { %s746_s10 = scalar_lea.sflag [#allocation3], %s745_s9 }
 0x266   : > { %p937_p0 = pnand %p940_p13, %p1130_p6 }
 0x268   : > { %p938_p1 = pneg %p937_p0 }
 0x26a   : > { %1041 = dma.done.wait (%p938_p1), %s746_s10, 256  }
 0x26b   : > { %1043 = vsyncadd (%p938_p1), %s746_s10, 4294967040  ;;  %p13_p2 = scmp.ge.s32.totalorder %s1113_s18, 4   ;;  %s1368_s12 = smov %s1050_s13 }
 0x26c   : > { %s1369_s13 = smov %s1054_s14  ;;  %s1370_s14 = smov %s1124_s21 }
 0x26d   : > { %s1371_s15 = smov %s1113_s18  ;;  %15 = sbr.rel (!%p13_p2) target bundleno = 3 (0x3), region = 69 }
 0x272   :  { %751 = vsyncpa [#allocation3], 1 }
 0x273   :  { %753 = vsyncpa [#allocation3 + $0x1], 1 }

// kernel: _encoder_forward.8
= control target key start
LH: loop header
LB: loop body
LE: loop exit
PB: predicated region body
PF: predicated region fallthrough
CT: control target
= control target key end

     0   :  { %s1004_s12 = smov 0   ;;  %s1237_s0 = inlined_call_operand.vmem [shape: bf16[2,6,6,32], index: 0, kind: input, shape index: {}]   ;;  %s1238_s1 = inlined_call_operand.vmem [shape: bf16[3,96,8], index: 1, kind: input, shape index: {}]   ;;  %s1239_s2 = inlined_call_operand.vmem [shape: bf16[8,32], index: 2, kind: input, shape index: {}]   ;;  %s1240_s3 = inlined_call_operand.vmem [shape: bf16[2,6,6,32], index: 3, kind: output, shape index: {}]  }
   0x1 LB: > { %s791_s13 = sadd.s32 4294967295, %s976_s12   ;;  %p795_p0 = scmp.ge.s32.totalorder %s976_s12, 1  ;;  %s976_s12 = sphi %s1004_s12, %s13_s12  }
   0x2   : > { %p137_p1 = scmp.lt.s32.totalorder %s976_s12, 3 }
   0x4   : > { %p138_p2 = pnand %p795_p0, %p137_p1 }
   0x5   : > { %p161_p3 = scmp.lt.s32.totalorder (!%p138_p2), %s791_s13, 1  ;;  %s980_s7 = smov (!%p138_p2), 64  }
   0x6   : > { %141 = sbr.rel (%p138_p2) target bundleno = 591 (0x24f), region = 32  ;;  %s981_s14 = smov (!%p138_p2), 32  }
   0xb   : > { %v978_v0 = vmov 0.0   ;;  %v952_v1 = vld [vmem:[%s1238_s1 + $0x58] sm:$0xff]   ;;  %s1244_s13 = smov (!%p161_p3, %s791_s13), 1  ;;  %v953_v2 = vld [vmem:[%s1238_s1 + $0x50] sm:$0xff]   ;;  %v954_v3 = vld [vmem:[%s1238_s1 + $0x28] sm:$0xff]   ;;  %v979_v9 = vmov 0  }
   0xc   : > { %883 = vmatprep.subr.bf16.mxu0 %v978_v0  ;;  %899 = vmatprep.subr.bf16.mxu1 %v978_v0  ;;  %s937_s20 = smul.u32 24, %s1244_s13  ;;  %v956_v4 = vld [vmem:[%s1238_s1 + $0x20] sm:$0xff]   ;;  %v955_v5 = vld [vmem:[%s1238_s1 + $0x48] sm:$0xff]   ;;  %v958_v17 = vld [vmem:[%s1238_s1 + $0x18] sm:$0xff]   ;;  %vm982_vm0 = vmmov 0   ;;  %vm244_vm1 = vcmask 261120  }
   0xd   : > { %884 = vmatpush3.bf16.msra.mxu0 %v952_v1  ;;  %900 = vmatpush3.bf16.msra.mxu1 %v954_v3  ;;  %v957_v22 = vld [vmem:[%s1238_s1 + $0x40] sm:$0xff]   ;;  %v960_v32 = vld [vmem:[%s1238_s1 + $0x10] sm:$0xff]   ;;  %v959_v40 = vld [vmem:[%s1238_s1 + $0x38] sm:$0xff]   ;;  %v983_v3 = vmov 1983009808   ;;  %vm257_vm2 = vcmask 523264  }
   0xe   : > { %885 = vmatprep.subr.bf16.mxu0 %v978_v0  ;;  %s165_s25 = scalar_lea.vmem %s1237_s0, %s937_s20  ;;  %901 = vmatprep.subr.bf16.mxu1 %v978_v0  ;;  %v962_v45 = vld [vmem:[%s1238_s1 + $0x8] sm:$0xff]   ;;  %v961_v51 = vld [vmem:[%s1238_s1 + $0x30] sm:$0xff]   ;;  %v964_v55 = vld [vmem:[%s1238_s1] sm:$0xff]   ;;  %vm368_vm3 = vcmask 785408   ;;  %vm644_vm4 = vcmask 1043456   ;;  %vm640_vm5 = vcmask 64512   ;;  %s1189_s9 = scalar_lea.vmem %s1240_s3, %s937_s20 }
   0xf   : > { %v1039_v6 = vld [vmem:[%s165_s25 + $0x8] sm:$0x7]  ;;  %v1041_v7 = vld [vmem:[%s165_s25 + $0x4] sm:$0x7]  ;;  %v1043_v8 = vld [vmem:[%s165_s25 + $0xc] sm:$0x7]  ;;  %895 = vmatprep.mubr.msk.bf16.mxu0 %vm982_vm0, %v978_v0  ;;  %911 = vmatprep.mubr.msk.bf16.mxu1 %vm982_vm0, %v978_v0 }
  0x10   : > { %v1047_v10 = vmax.bf16 %v979_v9, %v1039_v6  ;;  %v1051_v11 = vmax.bf16 %v979_v9, %v1041_v7  ;;  %v1055_v12 = vmax.bf16 %v979_v9, %v1043_v8  ;;  %v1057_v13 = vld [vmem:[%s165_s25 + $0x10] sm:$0x7]  ;;  %v172_v14 = vld [vmem:[%s165_s25] sm:$0x7]  ;;  %v177_v15 = vld [vmem:[%s165_s25 + $0x14] sm:$0x7] }
  0x11   : > { %886 = vmatpush3.bf16.msra.mxu0 %v953_v2  ;;  %v1062_v16 = vmax.bf16 %v979_v9, %v1057_v13  ;;  %902 = vmatpush3.bf16.msra.mxu1 %v956_v4  ;;  %v1076_v21 = vmax.bf16 %v979_v9, %v172_v14  ;;  %v1085_v24 = vmax.bf16 %v979_v9, %v177_v15  ;;  %v318_v4 = vunpack.c.l.s4 %v983_v3 }
  0x12   : > { %887 = vmatprep.subr.bf16.mxu0 %v978_v0  ;;  %v800_v18 = vcombine.low %v1047_v10, %v1047_v10  ;;  %v799_v19 = vcombine.low %v1051_v11, %v1051_v11  ;;  %v1073_v20 = vcombine.low %v1055_v12, %v1055_v12  ;;  %903 = vmatprep.subr.bf16.mxu1 %v978_v0  ;;  %vm709_vm6 = vcmask 256000  }
  0x13   : > { %v802_v23 = vcombine.low %v1062_v16, %v1062_v16  ;;  %v798_v36 = vcombine.low %v1076_v21, %v1076_v21  ;;  %v829_v43 = vcombine.low %v1085_v24, %v1085_v24  ;;  %710 = vst.msk [vmem:[%s1189_s9] sm:$0x7] %vm709_vm6, %v979_v9  ;;  %711 = vst.msk [vmem:[%s1189_s9 + $0x4] sm:$0x7] %vm709_vm6, %v979_v9  ;;  %vm722_vm7 = vsmask.f32 2306 }
  0x14   : > { %v234_v25 = vrot.slane %v800_v18, 1  ;;  %v233_v26 = vrot.slane %v799_v19, 1  ;;  %v218_v27 = vshrl.u32 %v1073_v20, 16  ;;  %v220_v28 = vshll.u32 %v1073_v20, 16  ;;  %712 = vst.msk [vmem:[%s1189_s9 + $0x8] sm:$0x7] %vm709_vm6, %v979_v9  ;;  %vm1213_vm8 = vmand %vm709_vm6, %vm722_vm7 }
  0x15   : > { %888 = vmatpush3.bf16.msra.mxu0 %v955_v5  ;;  %v204_v29 = vshrl.u32 %v799_v19, 16  ;;  %v206_v30 = vshll.u32 %v799_v19, 16  ;;  %v284_v31 = vshll.u32 %v802_v23, 16  ;;  %904 = vmatpush3.bf16.msra.mxu1 %v958_v17  ;;  %v282_v34 = vshrl.u32 %v802_v23, 16  ;;  %715 = vst.msk [vmem:[%s1189_s9 + $0x14] sm:$0x7] %vm709_vm6, %v979_v9 }
  0x16   : > { %889 = vmatprep.subr.bf16.mxu0 %v978_v0  ;;  %240 = vrot.lane.b32.xlu1 %v234_v25, %s980_s7  ;;  %v222_v33 = vrot.slane %v220_v28, 1  ;;  %v213_v35 = vshll.u32 %v800_v18, 16  ;;  %v211_v39 = vshrl.u32 %v800_v18, 16  ;;  %v199_v47 = vshll.u32 %v798_v36, 16  ;;  %713 = vst.msk [vmem:[%s1189_s9 + $0xc] sm:$0x7] %vm709_vm6, %v979_v9 }
  0x17   : > { %238 = vrot.lane.b32.xlu0 %v233_v26, %s980_s7  ;;  %v208_v37 = vrot.slane %v206_v30, 1  ;;  %v286_v38 = vrot.slane %v284_v31, 1  ;;  %905 = vmatprep.subr.bf16.mxu1 %v978_v0  ;;  %v290_v49 = vrot.slane %v802_v23, 1  ;;  %v235_v50 = vrot.slane %v1073_v20, 1  ;;  %714 = vst.msk [vmem:[%s1189_s9 + $0x10] sm:$0x7] %vm709_vm6, %v979_v9 }
  0x18   : > { %v223_v41 = vor.u32 %v222_v33, %v218_v27  ;;  %v215_v42 = vrot.slane %v213_v35, 1  ;;  %v197_v52 = vshrl.u32 %v798_v36, 16  ;;  %v517_v53 = vshll.u32 %v829_v43, 16 }
  0x19   : > { %890 = vmatpush3.bf16.msra.mxu0 %v957_v22  ;;  %v209_v44 = vor.u32 %v208_v37, %v204_v29  ;;  %906 = vmatpush3.bf16.msra.mxu1 %v960_v32  ;;  %v287_v46 = vor.u32 %v286_v38, %v282_v34  ;;  %v201_v54 = vrot.slane %v199_v47, 1  ;;  %v232_v56 = vrot.slane %v798_v36, 1  ;;  %v967_v47 = vld [vmem:[%s1238_s1 + $0x70] sm:$0xff]  }
  0x1a   : > { %891 = vmatprep.subr.bf16.mxu0 %v978_v0  ;;  %230 = vrot.lane.b32.xlu1 %v223_v41, %s981_s14  ;;  %v216_v48 = vor.u32 %v215_v42, %v211_v39  ;;  %v515_v58 = vshrl.u32 %v829_v43, 16  ;;  %v519_v59 = vrot.slane %v517_v53, 1  ;;  %v523_v60 = vrot.slane %v829_v43, 1  ;;  %v965_v42 = vld [vmem:[%s1238_s1 + $0x80] sm:$0xff]  }
  0x1b   : > { %907 = vmatprep.subr.bf16.mxu1 %v978_v0  ;;  %226 = vrot.lane.b32.xlu0 %v209_v44, %s981_s14  ;;  %v202_v57 = vor.u32 %v201_v54, %v197_v52  ;;  %v320_v5 = vlaneseq  ;;  %v319_v18 = vunpack.c.0.s8 %v318_v4  ;;  %v966_v44 = vld [vmem:[%s1238_s1 + $0x78] sm:$0xff]   ;;  %v639_v53 = vld [vmem:[%s1239_s2] sm:$0xf] }
  0x1c   : > { %v520_v61 = vor.u32 %v519_v59, %v515_v58  ;;  %v646_v54 = vsel %vm644_vm4, %v639_v53, 0 }
  0x1d   : > { %892 = vmatpush3.bf16.msra.mxu0 %v959_v40  ;;  %908 = vmatpush3.bf16.msra.mxu1 %v962_v45  ;;  %v321_v19 = vshrl.u32 %v320_v5, 7 }
  0x1e   : > { %893 = vmatprep.subr.bf16.mxu0 %v978_v0  ;;  %288 = vrot.lane.b32.xlu1 %v287_v46, %s981_s14 }
  0x1f   : > { %909 = vmatprep.subr.bf16.mxu1 %v978_v0  ;;  %228 = vrot.lane.b32.xlu0 %v216_v48, %s981_s14  ;;  %v322_v28 = vsub.s32 %v319_v18, %v321_v19  ;;  %v693_v19 = vunpack.c.l.bf16 %v1041_v7  ;;  %v850_v7 = vld [vmem:[%s1189_s9 + $0x4] sm:$0x7] }
  0x21   : > { %894 = vmatpush3.bf16.msra.mxu0 %v961_v51  ;;  %910 = vmatpush3.bf16.msra.mxu1 %v964_v55 }
  0x22   : > { %915 = vmatprep.subr.bf16.mxu0 %v978_v0  ;;  %291 = vrot.lane.b32.xlu1 %v290_v49, %s980_s7  ;;  %v968_v49 = vld [vmem:[%s1238_s1 + $0x68] sm:$0xff]  }
  0x23   : > { %931 = vmatprep.subr.bf16.mxu1 %v978_v0  ;;  %242 = vrot.lane.b32.xlu0 %v235_v50, %s980_s7 }
  0x26   : > { %236 = vrot.lane.b32.xlu1 %v232_v56, %s980_s7 }
  0x27   : > { %224 = vrot.lane.b32.xlu0 %v202_v57, %s981_s14 }
  0x2a   : > { %524 = vrot.lane.b32.xlu1 %v523_v60, %s980_s7 }
  0x2b   : > { %521 = vrot.lane.b32.xlu0 %v520_v61, %s981_s14 }
  0x88   : > { %v241_v62 = vpop.permute.xlu1 %240 }
  0x89   : > { %v239_v63 = vpop.permute.xlu0 %238 }
  0x8c   : > { %v231_v1 = vpop.permute.xlu1 %230 }
  0x8d   : > { %v227_v2 = vpop.permute.xlu0 %226  ;;  %v256_v27 = vsel %vm244_vm1, %v1055_v12, %v231_v1  ;;  %v963_v12 = vld [vmem:[%s1238_s1 + $0x88] sm:$0xff]  }
  0x8e   : > { %v250_v15 = vsel %vm244_vm1, %v1051_v11, %v227_v2 }
  0x8f   : > { %v261_v26 = vsel %vm257_vm2, %v250_v15, %v239_v63 }
  0x90   : > { %v289_v14 = vpop.permute.xlu1 %288 }
  0x91   : > { %v229_v17 = vpop.permute.xlu0 %228  ;;  %v295_v23 = vsel %vm244_vm1, %v1062_v16, %v289_v14 }
  0x92   : > { %v253_v20 = vsel %vm244_vm1, %v1047_v10, %v229_v17 }
  0x93   : > { %v263_v22 = vsel %vm257_vm2, %v253_v20, %v241_v62 }
  0x94   : > { %v292_v25 = vpop.permute.xlu1 %291  ;;  %v315_v30 = vcombine.low %v261_v26, %v263_v22 }
  0x95   : > { %v297_v11 = vsel %vm257_vm2, %v295_v23, %v292_v25  ;;  %v243_v29 = vpop.permute.xlu0 %242  ;;  %v694_v23 = vunpack.c.l.bf16 %v1039_v6 }
  0x96   : > { %v265_v31 = vsel %vm257_vm2, %v256_v27, %v243_v29  ;;  %v323_v35 = vrot.slane %v315_v30, %v322_v28  ;;  %v696_v30 = vunpack.c.l.bf16 %v1057_v13 }
  0x97   : > { %v316_v32 = vcombine.low %v265_v31, %v297_v11  ;;  %v415_v36 = vcombine.low %v263_v22, %v265_v31 }
  0x98   : > { %v237_v10 = vpop.permute.xlu1 %236 }
  0x99   : > { %v330_v33 = vrot.slane %v316_v32, %v322_v28  ;;  %v225_v34 = vpop.permute.xlu0 %224  ;;  %v429_v40 = vrot.slane %v415_v36, %v322_v28 }
  0x9a   : > { %v247_v16 = vsel %vm244_vm1, %v1076_v21, %v225_v34 }
  0x9b   : > { %v259_v37 = vsel %vm257_vm2, %v247_v16, %v237_v10  ;;  %v331_v38 = vcombine.low %v323_v35, %v330_v33  ;;  %v852_v33 = vld [vmem:[%s1189_s9 + $0x8] sm:$0x7] }
  0x9c   : > { %v414_v39 = vcombine.low %v259_v37, %v261_v26  ;;  %v525_v46 = vpop.permute.xlu1 %524 }
  0x9d   : > { %896 = vmatmul.mubr.msk.bf16.vlgmr.msra.gmra.mxu0 %vm368_vm3, %v331_v38  ;;  %v522_v43 = vpop.permute.xlu0 %521 }
  0x9e   : > { %v422_v41 = vrot.slane %v414_v39, %v322_v28  ;;  %916 = vmatpush3.bf16.msra.mxu0 %v963_v12  ;;  %927 = vmatprep.mubr.msk.bf16.mxu0 %vm982_vm0, %v978_v0  ;;  %v528_v45 = vsel %vm244_vm1, %v1085_v24, %v522_v43  ;;  %v969_v24 = vld [vmem:[%s1238_s1 + $0x60] sm:$0xff]   ;;  %v854_v12 = vld [vmem:[%s1189_s9 + $0xc] sm:$0x7]  ;;  %v856_v39 = vld [vmem:[%s1189_s9 + $0x10] sm:$0x7] }
  0x9f   : > { %917 = vmatprep.subr.bf16.mxu0 %v978_v0  ;;  %v530_v48 = vsel %vm257_vm2, %v528_v45, %v525_v46 }
  0xa0   : > { %v430_v21 = vcombine.low %v422_v41, %v429_v40  ;;  %v545_v50 = vcombine.low %v297_v11, %v530_v48 }
  0xa2   : > { %918 = vmatpush3.bf16.msra.mxu0 %v965_v42  ;;  %912 = vmatmul.mubr.msk.bf16.vlgmr.msra.gmra.mxu1 %vm368_vm3, %v430_v21  ;;  %v552_v51 = vrot.slane %v545_v50, %v322_v28  ;;  %v695_v28 = vunpack.c.l.bf16 %v1043_v8 }
  0xa3   : > { %919 = vmatprep.subr.bf16.mxu0 %v978_v0  ;;  %933 = vmatprep.mubr.msk.bf16.mxu1 %vm982_vm0, %v978_v0 }
  0xa4   : > { %v553_v52 = vcombine.low %v429_v40, %v552_v51  ;;  %932 = vmatpush3.bf16.msra.mxu1 %v646_v54 }
  0xa6   : > { %920 = vmatpush3.bf16.msra.mxu0 %v966_v44 }
  0xa7   : > { %921 = vmatprep.subr.bf16.mxu0 %v978_v0 }
  0xaa   : > { %922 = vmatpush3.bf16.msra.mxu0 %v967_v47 }
  0xab   : > { %923 = vmatprep.subr.bf16.mxu0 %v978_v0 }
  0xae   : > { %924 = vmatpush3.bf16.msra.mxu0 %v968_v49 }
  0xaf   : > { %925 = vmatprep.subr.bf16.mxu0 %v978_v0 }
  0xb2   : > { %926 = vmatpush3.bf16.msra.mxu0 %v969_v24 }
  0xb5   : > { %928 = vmatmul.mubr.msk.bf16.vlgmr.msra.gmra.mxu0 %vm368_vm3, %v553_v52 }
 0x15d   : > { %v406_v55 = vpop.f32.mrf.mxu0 }
 0x15f   : > { %v897_v56 = vpop.f32.mrf.mxu0 }
 0x161   : > { %v409_v57 = vpop.f32.mrf.mxu0 }
 0x162   : > { %v504_v58 = vpop.f32.mrf.mxu1 }
 0x163   : > { %v898_v59 = vpop.f32.mrf.mxu0  ;;  %v505_v63 = vadd.f32 %v504_v58, %v406_v55 }
 0x164   : > { %v913_v60 = vpop.f32.mrf.mxu1 }
 0x166   : > { %v507_v61 = vpop.f32.mrf.mxu1 }
 0x167   : > { %v508_v2 = vadd.f32 %v507_v61, %v409_v57 }
 0x168   : > { %v914_v0 = vpop.f32.mrf.mxu1 }
 0x175   : > { %v627_v62 = vpop.f32.mrf.mxu0 }
 0x176   : > { %v634_v3 = vadd.f32 %v627_v62, %v505_v63 }
 0x177   : > { %v929_v1 = vpop.f32.mrf.mxu0 }
 0x178   : > { %v636_v15 = vmax.f32 %v634_v3, 0.0 }
 0x179   : > { %v630_v4 = vpop.f32.mrf.mxu0 }
 0x17a   : > { %v635_v5 = vadd.f32 %v630_v4, %v508_v2 }
 0x17b   : > { %v930_v14 = vpop.f32.mrf.mxu0 }
 0x17c   : > { %v637_v17 = vmax.f32 %v635_v5, 0.0 }
 0x17e   : > { %v638_v18 = vpack.c.bf16 %v637_v17, %v636_v15 }
 0x180   : > { %934 = vmatmul.mubr.msk.bf16.vlgmr.msra.gmra.mxu1 %vm640_vm5, %v638_v18 }
 0x240   : > { %v682_v20 = vpop.f32.mrf.mxu1 }
 0x241   : > { %v691_v22 = vcombine.high %v682_v20, %v682_v20  ;;  %v697_v25 = vrot.slane %v682_v20, 7 }
 0x242   : > { %v935_v26 = vpop.f32.mrf.mxu1 }
 0x243   : > { %v698_v27 = vrot.slane %v691_v22, 7  ;;  %v705_v11 = vadd.f32 %v697_v25, %v693_v19 }
 0x244   : > { %v685_v9 = vpop.f32.mrf.mxu1 }
 0x245   : > { %v706_v6 = vadd.f32 %v698_v27, %v694_v23  ;;  %v716_v31 = vpack.c.bf16 %v705_v11, %v705_v11  ;;  %v692_v32 = vcombine.high %v685_v9, %v685_v9  ;;  %v699_v10 = vrot.slane %v685_v9, 7 }
 0x246   : > { %v936_v34 = vpop.f32.mrf.mxu1 }
 0x247   : > { %v717_v8 = vpack.c.bf16 %v706_v6, %v706_v6  ;;  %v725_v35 = vsel %vm1213_vm8, %v716_v31, %v850_v7  ;;  %v700_v36 = vrot.slane %v692_v32, 7  ;;  %v707_v16 = vadd.f32 %v699_v10, %v695_v28 }
 0x248   : > { %851 = vst [vmem:[%s1189_s9 + $0x4] sm:$0x7] %v725_v35 }
 0x249   : > { %v728_v13 = vsel %vm1213_vm8, %v717_v8, %v852_v33  ;;  %v708_v37 = vadd.f32 %v700_v36, %v696_v30  ;;  %v718_v38 = vpack.c.bf16 %v707_v16, %v707_v16 }
 0x24a   : > { %853 = vst [vmem:[%s1189_s9 + $0x8] sm:$0x7] %v728_v13 }
 0x24b   : > { %v719_v40 = vpack.c.bf16 %v708_v37, %v708_v37  ;;  %v731_v41 = vsel %vm1213_vm8, %v718_v38, %v854_v12 }
 0x24c   : > { %855 = vst [vmem:[%s1189_s9 + $0xc] sm:$0x7] %v731_v41 }
 0x24d   : > { %v734_v42 = vsel %vm1213_vm8, %v719_v40, %v856_v39 }
 0x24e   : > { %857 = vst [vmem:[%s1189_s9 + $0x10] sm:$0x7] %v734_v42 }
 0x24f PF: > { %s13_s12 = sadd.s32 1, %s976_s12  }
 0x250   : > { %p10_p4 = scmp.ge.s32.totalorder %s13_s12, 4  }
 0x252   :  { %12 = sbr.rel (!%p10_p4) target bundleno = 1 (0x1), region = 65 }

</bundles_post_ra>
